<compile_context>
chip_gen: v7x
topology: tpu7x:2x2x1
jax: 0.10.0
libtpu: 0.0.40
codegen_flags: <defaults>
</compile_context>

<pallas_src>
import functools

import jax
import jax.numpy as jnp
from jax import lax
from jax.experimental import pallas as pl
from jax.experimental.pallas import tpu as pltpu

EPS = 1e-5          # BatchNorm eps (PyTorch default)
NEG_SLOPE = 0.01    # LeakyReLU default negative slope


def _leaky(x):
    return jnp.where(x >= 0, x, NEG_SLOPE * x)


# ---------------------------------------------------------------------------
# Fused forward kernel
# ---------------------------------------------------------------------------
def fused_forward_kernel(xh_ref, lag_ref,
                         wc2_ref, sc2_ref, sh2_ref,
                         wsh_ref, wqkv_ref, bqkv_ref,
                         win_ref, bin_ref, wo_ref, bo_ref,
                         w1a_ref, w1b_ref, b1_ref, w2_ref, b2_ref, w3_ref, b3_ref,
                         out_ref, *, S, E, num_heads):
    f32 = jnp.float32
    B = xh_ref.shape[0]
    CiW = xh_ref.shape[2]
    Dh = E // num_heads

    # ---- (1) Conv2d(3x3,'same') + BN2d + LeakyReLU ------------------------------
    # im2col along H (3 shifted slices of the H-padded input); the W-direction conv
    # is folded into the precomputed Toeplitz weight, so a single K=3*Ci*W matmul
    # directly produces `flatten_conv_result` rows (b, h) with lane index co*W + w.
    xh = xh_ref[...]                                                  # (B, H+2, Ci*W)
    taps = jnp.concatenate([xh[:, kh:kh + S, :] for kh in range(3)], axis=-1)
    taps = taps.reshape(B * S, 3 * CiW)
    flat = jnp.dot(taps, wc2_ref[...], preferred_element_type=f32)
    flat = flat * sc2_ref[...] + sh2_ref[...]                         # folded conv bias + BN
    flat = jnp.where(flat >= 0, flat, NEG_SLOPE * flat)               # (B*S, E)

    # ---- (2) q/k/v Conv1d(k=3,'same') + BN1d ------------------------------------
    # +/-1 taps via precomputed shift matrices (boundary zeros come for free); the 3
    # taps sit on the contraction axis and the 3 branches on the output axis, so all
    # of q/k/v is one batched (3S,3S) x (3S,E) matmul with BN folded in.
    wsh = wsh_ref[...]                                                # (E, 2E)
    x_m1 = jnp.dot(flat, wsh[:, :E], preferred_element_type=f32).reshape(B, S, E)
    x_p1 = jnp.dot(flat, wsh[:, E:], preferred_element_type=f32).reshape(B, S, E)
    flat3 = flat.reshape(B, S, E)
    stacked = jnp.concatenate([x_m1, flat3, x_p1], axis=1)            # (B, 3S, E)
    w_qkv = jnp.broadcast_to(wqkv_ref[...], (B, 3 * S, 3 * S))
    qkv = jnp.einsum('boj,bjl->bol', w_qkv, stacked,
                     preferred_element_type=f32) + bqkv_ref[...]      # (B, 3S, E)

    # ---- (3) MultiheadAttention + residual --------------------------------------
    def in_proj(i):                                                   # i = 0/1/2 -> q/k/v
        x2 = qkv[:, i * S:(i + 1) * S, :].reshape(B * S, E)
        return jnp.dot(x2, win_ref[i], preferred_element_type=f32) + bin_ref[i]
    Qp, Kp, Vp = in_proj(0), in_proj(1), in_proj(2)                   # (B*S, E); Q pre-scaled

    def split_heads(x2):                                              # -> (nh*B, S, Dh)
        x3 = x2.reshape(B, S, E)
        return jnp.concatenate(
            [x3[:, :, h * Dh:(h + 1) * Dh] for h in range(num_heads)], axis=0)
    Qh, Kh, Vh = split_heads(Qp), split_heads(Kp), split_heads(Vp)

    scores = jnp.einsum('bqd,bkd->bqk', Qh, Kh, preferred_element_type=f32)
    scores = scores - jnp.max(scores, axis=-1, keepdims=True)
    probs = jnp.exp(scores)
    probs = probs / jnp.sum(probs, axis=-1, keepdims=True)            # exact recip: 1e-4 match
    ctx_h = jnp.einsum('bqk,bkd->bqd', probs, Vh, preferred_element_type=f32)
    ctx = jnp.concatenate(
        [ctx_h[h * B:(h + 1) * B] for h in range(num_heads)], axis=-1)  # (B, S, E)
    ctx = ctx.reshape(B * S, E)

    attn = jnp.dot(ctx, wo_ref[...], preferred_element_type=f32) + bo_ref[...] + flat

    # ---- (4) flatten + concat(lagged) + final MLP --------------------------------
    # torch.cat([flatten(attn), lagged]) is realized by splitting fc1's weight; the
    # wide (B, S*E) operand is assembled with lane concatenation (no minor reshapes).
    attn3 = attn.reshape(B, S, E)
    attn_wide = jnp.concatenate(
        [attn3[:, s:s + 1, :].reshape(B, E) for s in range(S)], axis=-1)   # (B, S*E)
    h = (jnp.dot(attn_wide, w1a_ref[...], preferred_element_type=f32)
         + jnp.dot(lag_ref[...], w1b_ref[...], preferred_element_type=f32)
         + b1_ref[...])
    h = jnp.where(h >= 0, h, NEG_SLOPE * h)
    h = jnp.dot(h, w2_ref[...], preferred_element_type=f32) + b2_ref[...]
    h = jnp.where(h >= 0, h, NEG_SLOPE * h)
    h = jnp.dot(h, w3_ref[...], preferred_element_type=f32) + b3_ref[...]
    out_ref[...] = jnp.maximum(h, 0.0)


# ---------------------------------------------------------------------------
# One-time parameter preprocessing (hoisted out of the forward path)
# ---------------------------------------------------------------------------
def prepare_params(p, *, num_of_eqp, num_of_status, in_channel_size, out_channel_size):
    f32 = jnp.float32
    H, W, Ci, Co = num_of_eqp, num_of_status, in_channel_size, out_channel_size
    S, E = H, Co * W
    nh = int(p['num_heads'])
    Dh = E // nh

    # Conv2d weight -> Toeplitz along W; rows (kh, ci, w'), cols (co, w).
    w2 = p['conv2d_w'].astype(f32)                                    # (Co, Ci, 3, 3)
    ww = jnp.arange(W)
    dw = ww[:, None] - ww[None, :] + 1                                # (W', W)
    vw = ((dw >= 0) & (dw < 3)).astype(f32)
    t = w2[:, :, :, jnp.clip(dw, 0, 2)] * vw[None, None, None]        # (Co, Ci, 3, W', W)
    wc2 = jnp.transpose(t, (2, 1, 3, 0, 4)).reshape(3 * Ci * W, Co * W)

    sc = p['bn2_g'] / jnp.sqrt(p['bn2_v'] + EPS)                      # fold conv bias + BN2d
    sh = (p['conv2d_b'] - p['bn2_m']) * sc + p['bn2_b']
    sc2 = jnp.repeat(sc, W).reshape(1, Co * W)
    sh2 = jnp.repeat(sh, W).reshape(1, Co * W)

    # Shift matrices for the conv1d +-1 taps (zero boundaries built in).
    idx = jnp.arange(E)
    shift_r = (idx[:, None] == idx[None, :] - 1).astype(f32)          # out[l] = x[l-1]
    shift_l = (idx[:, None] == idx[None, :] + 1).astype(f32)          # out[l] = x[l+1]
    wsh = jnp.concatenate([shift_r, shift_l], axis=1)                 # (E, 2E)

    # q/k/v Conv1d + BN1d -> (3S, 3S): rows (branch, o), cols (tap, i); BN folded.
    def branch(name):
        w = p[name + '_w'].astype(f32)                                # (o, i, t)
        s = p[name + '_bn_g'] / jnp.sqrt(p[name + '_bn_v'] + EPS)
        wr = jnp.transpose(w, (0, 2, 1)).reshape(H, 3 * H) * s[:, None]
        c = p[name + '_b'] * s + p[name + '_bn_b'] - p[name + '_bn_m'] * s
        return wr, c
    wq, cq = branch('q')
    wk, ck = branch('k')
    wv, cv = branch('v')
    wqkv = jnp.concatenate([wq, wk, wv], axis=0)                      # (3S, 3S)
    bqkv = jnp.tile(jnp.concatenate([cq, ck, cv])[None, :, None], (1, 1, E))  # (1, 3S, E)

    # MHA projection weights (1/sqrt(Dh) folded into the Q branch).
    Wi, bi = p['in_proj_w'].astype(f32), p['in_proj_b'].astype(f32)
    inv = 1.0 / float(Dh) ** 0.5
    win = jnp.stack([Wi[:E].T * inv, Wi[E:2 * E].T, Wi[2 * E:].T])    # (3, E, E)
    binp = jnp.stack([bi[:E] * inv, bi[E:2 * E], bi[2 * E:]])[:, None, :]  # (3, 1, E)
    wo = p['out_proj_w'].astype(f32).T
    bo = p['out_proj_b'].reshape(1, E)

    # Final MLP: split fc1 so cat([flatten(attn), lagged]) becomes two matmuls.
    SE = S * E
    w1a = p['fc1_w'][:, :SE].T
    w1b = p['fc1_w'][:, SE:].T
    b1 = p['fc1_b'].reshape(1, -1)
    w2l = p['fc2_w'].T
    b2 = p['fc2_b'].reshape(1, -1)
    w3l = p['fc3_w'].T
    b3 = p['fc3_b'].reshape(1, -1)

    arrays = (wc2, sc2, sh2, wsh, wqkv, bqkv, win, binp, wo, bo,
              w1a, w1b, b1, w2l, b2, w3l, b3)
    dims = dict(S=S, E=E, num_heads=nh, out_feat=int(p['fc3_w'].shape[0]))
    return arrays, dims


# ---------------------------------------------------------------------------
# Forward: one pallas_call (everything VMEM-resident, no grid at this toy size)
# ---------------------------------------------------------------------------
def forward_pallas(lagged, eqp_block, prep_arrays, dims):
    B, Ci, H, W = eqp_block.shape
    S, E, nh, Fo = dims['S'], dims['E'], dims['num_heads'], dims['out_feat']

    # Only per-call XLA glue: present the conv2d input as (B, H(+pad), Ci*W).
    x = jnp.transpose(eqp_block, (0, 2, 1, 3)).reshape(B, H, Ci * W)
    xh = jnp.pad(x, ((0, 0), (1, 1), (0, 0)))

    args = (xh, lagged.astype(jnp.float32)) + tuple(prep_arrays)
    kern = functools.partial(fused_forward_kernel, S=S, E=E, num_heads=nh)
    # TODO(synk): at production batch sizes add a grid over B (BlockSpecs tiled on the
    # batch dim) with dimension_semantics=("parallel",) so v7x's two TensorCores split it.
    return pl.pallas_call(
        kern,
        out_shape=jax.ShapeDtypeStruct((B, Fo), jnp.float32),
        in_specs=[pl.BlockSpec(memory_space=pltpu.MemorySpace.VMEM)] * len(args),
        out_specs=pl.BlockSpec(memory_space=pltpu.MemorySpace.VMEM),
    )(*args)


# ---------------------------------------------------------------------------
# Pure-JAX reference (same eval-mode semantics) for validation
# ---------------------------------------------------------------------------
def forward_ref(lagged, eqp_block, p):
    B, Ci, H, W = eqp_block.shape
    Co = p['conv2d_w'].shape[0]
    conv = lax.conv_general_dilated(eqp_block, p['conv2d_w'], (1, 1), 'SAME',
                                    dimension_numbers=('NCHW', 'OIHW', 'NCHW'))
    conv = conv + p['conv2d_b'][None, :, None, None]
    conv = ((conv - p['bn2_m'][None, :, None, None])
            * (p['bn2_g'] / jnp.sqrt(p['bn2_v'] + EPS))[None, :, None, None]
            + p['bn2_b'][None, :, None, None])
    conv = _leaky(conv)
    flat = jnp.concatenate([conv[:, i] for i in range(Co)], axis=-1)
    S, E = H, Co * W

    def conv1d(x, Wc, bc, g, bt, m, vv):
        L = x.shape[-1]
        xp = jnp.pad(x, ((0, 0), (0, 0), (1, 1)))
        out = sum(jnp.einsum('bil,oi->bol', xp[:, :, t:t + L], Wc[:, :, t])
                  for t in range(3))
        out = out + bc[None, :, None]
        return ((out - m[None, :, None])
                * (g / jnp.sqrt(vv + EPS))[None, :, None] + bt[None, :, None])

    q = conv1d(flat, p['q_w'], p['q_b'], p['q_bn_g'], p['q_bn_b'], p['q_bn_m'], p['q_bn_v'])
    k = conv1d(flat, p['k_w'], p['k_b'], p['k_bn_g'], p['k_bn_b'], p['k_bn_m'], p['k_bn_v'])
    v = conv1d(flat, p['v_w'], p['v_b'], p['v_bn_g'], p['v_bn_b'], p['v_bn_m'], p['v_bn_v'])

    nh = p['num_heads']
    Dh = E // nh
    Wi, bi = p['in_proj_w'], p['in_proj_b']
    Qp = q @ Wi[:E].T + bi[:E]
    Kp = k @ Wi[E:2 * E].T + bi[E:2 * E]
    Vp = v @ Wi[2 * E:].T + bi[2 * E:]

    def split(x):
        return x.reshape(B, S, nh, Dh).transpose(0, 2, 1, 3)

    Qh, Kh, Vh = split(Qp), split(Kp), split(Vp)
    scores = jnp.einsum('bhsd,bhtd->bhst', Qh, Kh) / jnp.sqrt(float(Dh))
    prob = jax.nn.softmax(scores, axis=-1)
    ctx = jnp.einsum('bhst,bhtd->bhsd', prob, Vh).transpose(0, 2, 1, 3).reshape(B, S, E)
    attn = ctx @ p['out_proj_w'].T + p['out_proj_b'] + flat

    feat = jnp.concatenate([attn.reshape(B, S * E), lagged], axis=-1)
    h = _leaky(feat @ p['fc1_w'].T + p['fc1_b'])
    h = _leaky(h @ p['fc2_w'].T + p['fc2_b'])
    return jnp.maximum(h @ p['fc3_w'].T + p['fc3_b'], 0.0)


if __name__ == "__main__":
    B = 2
    num_of_eqp = 8      # seq len / Conv2d H / Conv1d channels
    num_of_status = 8   # Conv2d W
    in_ch = 4
    out_ch = 4          # also num_heads
    out_feat = 1
    E = out_ch * num_of_status

    key = jax.random.PRNGKey(0)
    keys = iter(jax.random.split(key, 64))

    def nrm(shape, s=0.1):
        return (s * jax.random.normal(next(keys), shape)).astype(jnp.float32)

    p = {'num_heads': out_ch}
    p['conv2d_w'] = nrm((out_ch, in_ch, 3, 3))
    p['conv2d_b'] = nrm((out_ch,))
    p['bn2_g'] = 1.0 + nrm((out_ch,))
    p['bn2_b'] = nrm((out_ch,))
    p['bn2_m'] = jnp.zeros((out_ch,), jnp.float32)
    p['bn2_v'] = jnp.ones((out_ch,), jnp.float32)
    for name in ('q', 'k', 'v'):
        p[name + '_w'] = nrm((num_of_eqp, num_of_eqp, 3))
        p[name + '_b'] = nrm((num_of_eqp,))
        p[name + '_bn_g'] = 1.0 + nrm((num_of_eqp,))
        p[name + '_bn_b'] = nrm((num_of_eqp,))
        p[name + '_bn_m'] = jnp.zeros((num_of_eqp,), jnp.float32)
        p[name + '_bn_v'] = jnp.ones((num_of_eqp,), jnp.float32)
    p['in_proj_w'] = nrm((3 * E, E))
    p['in_proj_b'] = nrm((3 * E,))
    p['out_proj_w'] = nrm((E, E))
    p['out_proj_b'] = nrm((E,))
    F_in = 3 + num_of_eqp * num_of_status * out_ch            # 259
    p['fc1_w'] = nrm((256, F_in))
    p['fc1_b'] = nrm((256,))
    p['fc2_w'] = nrm((64, 256))
    p['fc2_b'] = nrm((64,))
    p['fc3_w'] = nrm((out_feat, 64))
    p['fc3_b'] = jnp.full((out_feat,), 0.5, jnp.float32)      # keep final ReLU active

    lagged_infos = nrm((B, 3), 1.0)
    eqp_status_block = nrm((B, in_ch, num_of_eqp, num_of_status), 1.0)

    # One-time weight preprocessing (hoisted out of the forward path).
    prep_arrays, dims = prepare_params(
        p, num_of_eqp=num_of_eqp, num_of_status=num_of_status,
        in_channel_size=in_ch, out_channel_size=out_ch)
    fwd = jax.jit(functools.partial(forward_pallas, prep_arrays=prep_arrays, dims=dims))

    out = jax.block_until_ready(fwd(lagged_infos, eqp_status_block))
    ref = jax.block_until_ready(forward_ref(lagged_infos, eqp_status_block, p))

    assert out.shape == (B, out_feat), out.shape
    assert jnp.allclose(out, ref, atol=1e-4, rtol=1e-4), (out, ref)
    print("KERNEL_OK")
</pallas_src>

<mosaic_0001>
module attributes {stable_mosaic.version = 11 : i64} {
  func.func @fused_forward_kernel(%arg0: memref<2x10x32xf32, #tpu.memory_space<vmem>>, %arg1: memref<2x3xf32, #tpu.memory_space<vmem>>, %arg2: memref<96x32xf32, #tpu.memory_space<vmem>>, %arg3: memref<1x32xf32, #tpu.memory_space<vmem>>, %arg4: memref<1x32xf32, #tpu.memory_space<vmem>>, %arg5: memref<32x64xf32, #tpu.memory_space<vmem>>, %arg6: memref<24x24xf32, #tpu.memory_space<vmem>>, %arg7: memref<1x24x32xf32, #tpu.memory_space<vmem>>, %arg8: memref<3x32x32xf32, #tpu.memory_space<vmem>>, %arg9: memref<3x1x32xf32, #tpu.memory_space<vmem>>, %arg10: memref<32x32xf32, #tpu.memory_space<vmem>>, %arg11: memref<1x32xf32, #tpu.memory_space<vmem>>, %arg12: memref<256x256xf32, #tpu.memory_space<vmem>>, %arg13: memref<3x256xf32, #tpu.memory_space<vmem>>, %arg14: memref<1x256xf32, #tpu.memory_space<vmem>>, %arg15: memref<256x64xf32, #tpu.memory_space<vmem>>, %arg16: memref<1x64xf32, #tpu.memory_space<vmem>>, %arg17: memref<64x1xf32, #tpu.memory_space<vmem>>, %arg18: memref<1x1xf32, #tpu.memory_space<vmem>>, %arg19: memref<2x1xf32, #tpu.memory_space<vmem>>) attributes {dimension_semantics = [], scalar_prefetch = 0 : i64, scratch_operands = 0 : i64, tpu.core_type = #tpu.core_type<tc>} {
    %c0 = arith.constant 0 : index
    %c0_0 = arith.constant 0 : index
    %c0_1 = arith.constant 0 : index
    %0 = vector.load %arg0[%c0, %c0_0, %c0_1] : memref<2x10x32xf32, #tpu.memory_space<vmem>>, vector<2x10x32xf32>
    %1 = vector.extract_strided_slice %0 {offsets = [0, 0, 0], sizes = [2, 8, 32], strides = [1, 1, 1]} : vector<2x10x32xf32> to vector<2x8x32xf32>
    %2 = vector.extract_strided_slice %0 {offsets = [0, 1, 0], sizes = [2, 8, 32], strides = [1, 1, 1]} : vector<2x10x32xf32> to vector<2x8x32xf32>
    %3 = vector.extract_strided_slice %0 {offsets = [0, 2, 0], sizes = [2, 8, 32], strides = [1, 1, 1]} : vector<2x10x32xf32> to vector<2x8x32xf32>
    %4 = tpu.concatenate %1, %2, %3 in 2 : vector<2x8x32xf32>, vector<2x8x32xf32>, vector<2x8x32xf32> -> vector<2x8x96xf32>
    %5 = vector.shape_cast %4 : vector<2x8x96xf32> to vector<16x96xf32>
    %c0_2 = arith.constant 0 : index
    %c0_3 = arith.constant 0 : index
    %6 = vector.load %arg2[%c0_2, %c0_3] : memref<96x32xf32, #tpu.memory_space<vmem>>, vector<96x32xf32>
    %cst = arith.constant dense<0.000000e+00> : vector<16x32xf32>
    %7 = tpu.matmul %5, %6, %cst {dimension_numbers = #tpu.dot_dimension_numbers<[1], [0], [0], [1], [0, 0, 1, 1], [], []>} : vector<16x96xf32>, vector<96x32xf32>, vector<16x32xf32> -> vector<16x32xf32>
    %c0_4 = arith.constant 0 : index
    %c0_5 = arith.constant 0 : index
    %8 = vector.load %arg3[%c0_4, %c0_5] : memref<1x32xf32, #tpu.memory_space<vmem>>, vector<1x32xf32>
    %9 = vector.broadcast %8 : vector<1x32xf32> to vector<16x32xf32>
    %10 = arith.mulf %7, %9 : vector<16x32xf32>
    %c0_6 = arith.constant 0 : index
    %c0_7 = arith.constant 0 : index
    %11 = vector.load %arg4[%c0_6, %c0_7] : memref<1x32xf32, #tpu.memory_space<vmem>>, vector<1x32xf32>
    %12 = vector.broadcast %11 : vector<1x32xf32> to vector<16x32xf32>
    %13 = arith.addf %10, %12 : vector<16x32xf32>
    %cst_8 = arith.constant 0.000000e+00 : f32
    %14 = vector.broadcast %cst_8 : f32 to vector<16x32xf32>
    %15 = arith.cmpf oge, %13, %14 : vector<16x32xf32>
    %cst_9 = arith.constant 0.00999999977 : f32
    %16 = vector.broadcast %cst_9 : f32 to vector<16x32xf32>
    %17 = arith.mulf %16, %13 : vector<16x32xf32>
    %18 = arith.select %15, %13, %17 : vector<16x32xi1>, vector<16x32xf32>
    %c0_10 = arith.constant 0 : index
    %c0_11 = arith.constant 0 : index
    %19 = vector.load %arg5[%c0_10, %c0_11] : memref<32x64xf32, #tpu.memory_space<vmem>>, vector<32x64xf32>
    %20 = vector.extract_strided_slice %19 {offsets = [0, 0], sizes = [32, 32], strides = [1, 1]} : vector<32x64xf32> to vector<32x32xf32>
    %cst_12 = arith.constant dense<0.000000e+00> : vector<16x32xf32>
    %21 = tpu.matmul %18, %20, %cst_12 {dimension_numbers = #tpu.dot_dimension_numbers<[1], [0], [0], [1], [0, 0, 1, 1], [], []>} : vector<16x32xf32>, vector<32x32xf32>, vector<16x32xf32> -> vector<16x32xf32>
    %22 = vector.shape_cast %21 : vector<16x32xf32> to vector<2x8x32xf32>
    %23 = vector.extract_strided_slice %19 {offsets = [0, 32], sizes = [32, 32], strides = [1, 1]} : vector<32x64xf32> to vector<32x32xf32>
    %cst_13 = arith.constant dense<0.000000e+00> : vector<16x32xf32>
    %24 = tpu.matmul %18, %23, %cst_13 {dimension_numbers = #tpu.dot_dimension_numbers<[1], [0], [0], [1], [0, 0, 1, 1], [], []>} : vector<16x32xf32>, vector<32x32xf32>, vector<16x32xf32> -> vector<16x32xf32>
    %25 = vector.shape_cast %24 : vector<16x32xf32> to vector<2x8x32xf32>
    %26 = vector.shape_cast %18 : vector<16x32xf32> to vector<2x8x32xf32>
    %27 = tpu.concatenate %22, %26, %25 in 1 : vector<2x8x32xf32>, vector<2x8x32xf32>, vector<2x8x32xf32> -> vector<2x24x32xf32>
    %c0_14 = arith.constant 0 : index
    %c0_15 = arith.constant 0 : index
    %28 = vector.load %arg6[%c0_14, %c0_15] : memref<24x24xf32, #tpu.memory_space<vmem>>, vector<24x24xf32>
    %29 = vector.shape_cast %28 : vector<24x24xf32> to vector<1x24x24xf32>
    %30 = vector.broadcast %29 : vector<1x24x24xf32> to vector<2x24x24xf32>
    "tpu.trace_start"() <{level = 10 : i32, message = "boj,bjl->bol"}> : () -> ()
    %cst_16 = arith.constant dense<0.000000e+00> : vector<2x24x32xf32>
    %31 = tpu.matmul %30, %27, %cst_16 {dimension_numbers = #tpu.dot_dimension_numbers<[2], [1], [1], [2], [0, 0, 0, 1, 1, 2], [0], [0]>} : vector<2x24x24xf32>, vector<2x24x32xf32>, vector<2x24x32xf32> -> vector<2x24x32xf32>
    "tpu.trace_stop"() : () -> ()
    %c0_17 = arith.constant 0 : index
    %c0_18 = arith.constant 0 : index
    %c0_19 = arith.constant 0 : index
    %32 = vector.load %arg7[%c0_17, %c0_18, %c0_19] : memref<1x24x32xf32, #tpu.memory_space<vmem>>, vector<1x24x32xf32>
    %33 = vector.broadcast %32 : vector<1x24x32xf32> to vector<2x24x32xf32>
    %34 = arith.addf %31, %33 : vector<2x24x32xf32>
    %35 = vector.extract_strided_slice %34 {offsets = [0, 0, 0], sizes = [2, 8, 32], strides = [1, 1, 1]} : vector<2x24x32xf32> to vector<2x8x32xf32>
    %36 = vector.shape_cast %35 : vector<2x8x32xf32> to vector<16x32xf32>
    %c0_20 = arith.constant 0 : index
    %c0_21 = arith.constant 0 : index
    %c0_22 = arith.constant 0 : index
    %37 = vector.load %arg8[%c0_20, %c0_21, %c0_22] : memref<3x32x32xf32, #tpu.memory_space<vmem>>, vector<1x32x32xf32>
    %38 = vector.shape_cast %37 : vector<1x32x32xf32> to vector<32x32xf32>
    %cst_23 = arith.constant dense<0.000000e+00> : vector<16x32xf32>
    %39 = tpu.matmul %36, %38, %cst_23 {dimension_numbers = #tpu.dot_dimension_numbers<[1], [0], [0], [1], [0, 0, 1, 1], [], []>} : vector<16x32xf32>, vector<32x32xf32>, vector<16x32xf32> -> vector<16x32xf32>
    %c0_24 = arith.constant 0 : index
    %c0_25 = arith.constant 0 : index
    %c0_26 = arith.constant 0 : index
    %40 = vector.load %arg9[%c0_24, %c0_25, %c0_26] : memref<3x1x32xf32, #tpu.memory_space<vmem>>, vector<1x1x32xf32>
    %41 = vector.shape_cast %40 : vector<1x1x32xf32> to vector<1x32xf32>
    %42 = vector.broadcast %41 : vector<1x32xf32> to vector<16x32xf32>
    %43 = arith.addf %39, %42 : vector<16x32xf32>
    %44 = vector.extract_strided_slice %34 {offsets = [0, 8, 0], sizes = [2, 8, 32], strides = [1, 1, 1]} : vector<2x24x32xf32> to vector<2x8x32xf32>
    %45 = vector.shape_cast %44 : vector<2x8x32xf32> to vector<16x32xf32>
    %c1 = arith.constant 1 : index
    %c0_27 = arith.constant 0 : index
    %c0_28 = arith.constant 0 : index
    %46 = vector.load %arg8[%c1, %c0_27, %c0_28] : memref<3x32x32xf32, #tpu.memory_space<vmem>>, vector<1x32x32xf32>
    %47 = vector.shape_cast %46 : vector<1x32x32xf32> to vector<32x32xf32>
    %cst_29 = arith.constant dense<0.000000e+00> : vector<16x32xf32>
    %48 = tpu.matmul %45, %47, %cst_29 {dimension_numbers = #tpu.dot_dimension_numbers<[1], [0], [0], [1], [0, 0, 1, 1], [], []>} : vector<16x32xf32>, vector<32x32xf32>, vector<16x32xf32> -> vector<16x32xf32>
    %c1_30 = arith.constant 1 : index
    %c0_31 = arith.constant 0 : index
    %c0_32 = arith.constant 0 : index
    %49 = vector.load %arg9[%c1_30, %c0_31, %c0_32] : memref<3x1x32xf32, #tpu.memory_space<vmem>>, vector<1x1x32xf32>
    %50 = vector.shape_cast %49 : vector<1x1x32xf32> to vector<1x32xf32>
    %51 = vector.broadcast %50 : vector<1x32xf32> to vector<16x32xf32>
    %52 = arith.addf %48, %51 : vector<16x32xf32>
    %53 = vector.extract_strided_slice %34 {offsets = [0, 16, 0], sizes = [2, 8, 32], strides = [1, 1, 1]} : vector<2x24x32xf32> to vector<2x8x32xf32>
    %54 = vector.shape_cast %53 : vector<2x8x32xf32> to vector<16x32xf32>
    %c2 = arith.constant 2 : index
    %c0_33 = arith.constant 0 : index
    %c0_34 = arith.constant 0 : index
    %55 = vector.load %arg8[%c2, %c0_33, %c0_34] : memref<3x32x32xf32, #tpu.memory_space<vmem>>, vector<1x32x32xf32>
    %56 = vector.shape_cast %55 : vector<1x32x32xf32> to vector<32x32xf32>
    %cst_35 = arith.constant dense<0.000000e+00> : vector<16x32xf32>
    %57 = tpu.matmul %54, %56, %cst_35 {dimension_numbers = #tpu.dot_dimension_numbers<[1], [0], [0], [1], [0, 0, 1, 1], [], []>} : vector<16x32xf32>, vector<32x32xf32>, vector<16x32xf32> -> vector<16x32xf32>
    %c2_36 = arith.constant 2 : index
    %c0_37 = arith.constant 0 : index
    %c0_38 = arith.constant 0 : index
    %58 = vector.load %arg9[%c2_36, %c0_37, %c0_38] : memref<3x1x32xf32, #tpu.memory_space<vmem>>, vector<1x1x32xf32>
    %59 = vector.shape_cast %58 : vector<1x1x32xf32> to vector<1x32xf32>
    %60 = vector.broadcast %59 : vector<1x32xf32> to vector<16x32xf32>
    %61 = arith.addf %57, %60 : vector<16x32xf32>
    %62 = vector.shape_cast %43 : vector<16x32xf32> to vector<2x8x32xf32>
    %63 = vector.extract_strided_slice %62 {offsets = [0, 0, 0], sizes = [2, 8, 8], strides = [1, 1, 1]} : vector<2x8x32xf32> to vector<2x8x8xf32>
    %64 = vector.extract_strided_slice %62 {offsets = [0, 0, 8], sizes = [2, 8, 8], strides = [1, 1, 1]} : vector<2x8x32xf32> to vector<2x8x8xf32>
    %65 = vector.extract_strided_slice %62 {offsets = [0, 0, 16], sizes = [2, 8, 8], strides = [1, 1, 1]} : vector<2x8x32xf32> to vector<2x8x8xf32>
    %66 = vector.extract_strided_slice %62 {offsets = [0, 0, 24], sizes = [2, 8, 8], strides = [1, 1, 1]} : vector<2x8x32xf32> to vector<2x8x8xf32>
    %67 = tpu.concatenate %63, %64, %65, %66 in 0 : vector<2x8x8xf32>, vector<2x8x8xf32>, vector<2x8x8xf32>, vector<2x8x8xf32> -> vector<8x8x8xf32>
    %68 = vector.shape_cast %52 : vector<16x32xf32> to vector<2x8x32xf32>
    %69 = vector.extract_strided_slice %68 {offsets = [0, 0, 0], sizes = [2, 8, 8], strides = [1, 1, 1]} : vector<2x8x32xf32> to vector<2x8x8xf32>
    %70 = vector.extract_strided_slice %68 {offsets = [0, 0, 8], sizes = [2, 8, 8], strides = [1, 1, 1]} : vector<2x8x32xf32> to vector<2x8x8xf32>
    %71 = vector.extract_strided_slice %68 {offsets = [0, 0, 16], sizes = [2, 8, 8], strides = [1, 1, 1]} : vector<2x8x32xf32> to vector<2x8x8xf32>
    %72 = vector.extract_strided_slice %68 {offsets = [0, 0, 24], sizes = [2, 8, 8], strides = [1, 1, 1]} : vector<2x8x32xf32> to vector<2x8x8xf32>
    %73 = tpu.concatenate %69, %70, %71, %72 in 0 : vector<2x8x8xf32>, vector<2x8x8xf32>, vector<2x8x8xf32>, vector<2x8x8xf32> -> vector<8x8x8xf32>
    %74 = vector.shape_cast %61 : vector<16x32xf32> to vector<2x8x32xf32>
    %75 = vector.extract_strided_slice %74 {offsets = [0, 0, 0], sizes = [2, 8, 8], strides = [1, 1, 1]} : vector<2x8x32xf32> to vector<2x8x8xf32>
    %76 = vector.extract_strided_slice %74 {offsets = [0, 0, 8], sizes = [2, 8, 8], strides = [1, 1, 1]} : vector<2x8x32xf32> to vector<2x8x8xf32>
    %77 = vector.extract_strided_slice %74 {offsets = [0, 0, 16], sizes = [2, 8, 8], strides = [1, 1, 1]} : vector<2x8x32xf32> to vector<2x8x8xf32>
    %78 = vector.extract_strided_slice %74 {offsets = [0, 0, 24], sizes = [2, 8, 8], strides = [1, 1, 1]} : vector<2x8x32xf32> to vector<2x8x8xf32>
    %79 = tpu.concatenate %75, %76, %77, %78 in 0 : vector<2x8x8xf32>, vector<2x8x8xf32>, vector<2x8x8xf32>, vector<2x8x8xf32> -> vector<8x8x8xf32>
    "tpu.trace_start"() <{level = 10 : i32, message = "bqd,bkd->bqk"}> : () -> ()
    %cst_39 = arith.constant dense<0.000000e+00> : vector<8x8x8xf32>
    %80 = tpu.matmul %67, %73, %cst_39 {dimension_numbers = #tpu.dot_dimension_numbers<[2], [2], [1], [1], [0, 0, 0, 1, 1, 1], [0], [0]>} : vector<8x8x8xf32>, vector<8x8x8xf32>, vector<8x8x8xf32> -> vector<8x8x8xf32>
    "tpu.trace_stop"() : () -> ()
    %cst_40 = arith.constant dense<0xFF800000> : vector<8x8xf32>
    %81 = vector.multi_reduction <maximumf>, %80, %cst_40 [2] : vector<8x8x8xf32> to vector<8x8xf32>
    %82 = vector.shape_cast %81 : vector<8x8xf32> to vector<8x8x1xf32>
    %83 = vector.broadcast %82 : vector<8x8x1xf32> to vector<8x8x8xf32>
    %84 = arith.subf %80, %83 : vector<8x8x8xf32>
    %85 = math.exp %84 : vector<8x8x8xf32>
    %cst_41 = arith.constant dense<0.000000e+00> : vector<8x8xf32>
    %86 = vector.multi_reduction <add>, %85, %cst_41 [2] : vector<8x8x8xf32> to vector<8x8xf32>
    %87 = vector.shape_cast %86 : vector<8x8xf32> to vector<8x8x1xf32>
    %88 = vector.broadcast %87 : vector<8x8x1xf32> to vector<8x8x8xf32>
    %89 = arith.divf %85, %88 : vector<8x8x8xf32>
    "tpu.trace_start"() <{level = 10 : i32, message = "bqk,bkd->bqd"}> : () -> ()
    %cst_42 = arith.constant dense<0.000000e+00> : vector<8x8x8xf32>
    %90 = tpu.matmul %89, %79, %cst_42 {dimension_numbers = #tpu.dot_dimension_numbers<[2], [1], [1], [2], [0, 0, 0, 1, 1, 2], [0], [0]>} : vector<8x8x8xf32>, vector<8x8x8xf32>, vector<8x8x8xf32> -> vector<8x8x8xf32>
    "tpu.trace_stop"() : () -> ()
    %91 = vector.extract_strided_slice %90 {offsets = [0, 0, 0], sizes = [2, 8, 8], strides = [1, 1, 1]} : vector<8x8x8xf32> to vector<2x8x8xf32>
    %92 = vector.extract_strided_slice %90 {offsets = [2, 0, 0], sizes = [2, 8, 8], strides = [1, 1, 1]} : vector<8x8x8xf32> to vector<2x8x8xf32>
    %93 = vector.extract_strided_slice %90 {offsets = [4, 0, 0], sizes = [2, 8, 8], strides = [1, 1, 1]} : vector<8x8x8xf32> to vector<2x8x8xf32>
    %94 = vector.extract_strided_slice %90 {offsets = [6, 0, 0], sizes = [2, 8, 8], strides = [1, 1, 1]} : vector<8x8x8xf32> to vector<2x8x8xf32>
    %95 = tpu.concatenate %91, %92, %93, %94 in 2 : vector<2x8x8xf32>, vector<2x8x8xf32>, vector<2x8x8xf32>, vector<2x8x8xf32> -> vector<2x8x32xf32>
    %96 = vector.shape_cast %95 : vector<2x8x32xf32> to vector<16x32xf32>
    %c0_43 = arith.constant 0 : index
    %c0_44 = arith.constant 0 : index
    %97 = vector.load %arg10[%c0_43, %c0_44] : memref<32x32xf32, #tpu.memory_space<vmem>>, vector<32x32xf32>
    %cst_45 = arith.constant dense<0.000000e+00> : vector<16x32xf32>
    %98 = tpu.matmul %96, %97, %cst_45 {dimension_numbers = #tpu.dot_dimension_numbers<[1], [0], [0], [1], [0, 0, 1, 1], [], []>} : vector<16x32xf32>, vector<32x32xf32>, vector<16x32xf32> -> vector<16x32xf32>
    %c0_46 = arith.constant 0 : index
    %c0_47 = arith.constant 0 : index
    %99 = vector.load %arg11[%c0_46, %c0_47] : memref<1x32xf32, #tpu.memory_space<vmem>>, vector<1x32xf32>
    %100 = vector.broadcast %99 : vector<1x32xf32> to vector<16x32xf32>
    %101 = arith.addf %98, %100 : vector<16x32xf32>
    %102 = arith.addf %101, %18 : vector<16x32xf32>
    %103 = vector.shape_cast %102 : vector<16x32xf32> to vector<2x8x32xf32>
    %104 = vector.extract_strided_slice %103 {offsets = [0, 0, 0], sizes = [2, 1, 32], strides = [1, 1, 1]} : vector<2x8x32xf32> to vector<2x1x32xf32>
    %105 = vector.shape_cast %104 : vector<2x1x32xf32> to vector<2x32xf32>
    %106 = vector.extract_strided_slice %103 {offsets = [0, 1, 0], sizes = [2, 1, 32], strides = [1, 1, 1]} : vector<2x8x32xf32> to vector<2x1x32xf32>
    %107 = vector.shape_cast %106 : vector<2x1x32xf32> to vector<2x32xf32>
    %108 = vector.extract_strided_slice %103 {offsets = [0, 2, 0], sizes = [2, 1, 32], strides = [1, 1, 1]} : vector<2x8x32xf32> to vector<2x1x32xf32>
    %109 = vector.shape_cast %108 : vector<2x1x32xf32> to vector<2x32xf32>
    %110 = vector.extract_strided_slice %103 {offsets = [0, 3, 0], sizes = [2, 1, 32], strides = [1, 1, 1]} : vector<2x8x32xf32> to vector<2x1x32xf32>
    %111 = vector.shape_cast %110 : vector<2x1x32xf32> to vector<2x32xf32>
    %112 = vector.extract_strided_slice %103 {offsets = [0, 4, 0], sizes = [2, 1, 32], strides = [1, 1, 1]} : vector<2x8x32xf32> to vector<2x1x32xf32>
    %113 = vector.shape_cast %112 : vector<2x1x32xf32> to vector<2x32xf32>
    %114 = vector.extract_strided_slice %103 {offsets = [0, 5, 0], sizes = [2, 1, 32], strides = [1, 1, 1]} : vector<2x8x32xf32> to vector<2x1x32xf32>
    %115 = vector.shape_cast %114 : vector<2x1x32xf32> to vector<2x32xf32>
    %116 = vector.extract_strided_slice %103 {offsets = [0, 6, 0], sizes = [2, 1, 32], strides = [1, 1, 1]} : vector<2x8x32xf32> to vector<2x1x32xf32>
    %117 = vector.shape_cast %116 : vector<2x1x32xf32> to vector<2x32xf32>
    %118 = vector.extract_strided_slice %103 {offsets = [0, 7, 0], sizes = [2, 1, 32], strides = [1, 1, 1]} : vector<2x8x32xf32> to vector<2x1x32xf32>
    %119 = vector.shape_cast %118 : vector<2x1x32xf32> to vector<2x32xf32>
    %120 = tpu.concatenate %105, %107, %109, %111, %113, %115, %117, %119 in 1 : vector<2x32xf32>, vector<2x32xf32>, vector<2x32xf32>, vector<2x32xf32>, vector<2x32xf32>, vector<2x32xf32>, vector<2x32xf32>, vector<2x32xf32> -> vector<2x256xf32>
    %c0_48 = arith.constant 0 : index
    %c0_49 = arith.constant 0 : index
    %121 = vector.load %arg12[%c0_48, %c0_49] : memref<256x256xf32, #tpu.memory_space<vmem>>, vector<256x256xf32>
    %cst_50 = arith.constant dense<0.000000e+00> : vector<2x256xf32>
    %122 = tpu.matmul %120, %121, %cst_50 {dimension_numbers = #tpu.dot_dimension_numbers<[1], [0], [0], [1], [0, 0, 1, 1], [], []>} : vector<2x256xf32>, vector<256x256xf32>, vector<2x256xf32> -> vector<2x256xf32>
    %c0_51 = arith.constant 0 : index
    %c0_52 = arith.constant 0 : index
    %123 = vector.load %arg1[%c0_51, %c0_52] : memref<2x3xf32, #tpu.memory_space<vmem>>, vector<2x3xf32>
    %c0_53 = arith.constant 0 : index
    %c0_54 = arith.constant 0 : index
    %124 = vector.load %arg13[%c0_53, %c0_54] : memref<3x256xf32, #tpu.memory_space<vmem>>, vector<3x256xf32>
    %cst_55 = arith.constant dense<0.000000e+00> : vector<2x256xf32>
    %125 = tpu.matmul %123, %124, %cst_55 {dimension_numbers = #tpu.dot_dimension_numbers<[1], [0], [0], [1], [0, 0, 1, 1], [], []>} : vector<2x3xf32>, vector<3x256xf32>, vector<2x256xf32> -> vector<2x256xf32>
    %126 = arith.addf %122, %125 : vector<2x256xf32>
    %c0_56 = arith.constant 0 : index
    %c0_57 = arith.constant 0 : index
    %127 = vector.load %arg14[%c0_56, %c0_57] : memref<1x256xf32, #tpu.memory_space<vmem>>, vector<1x256xf32>
    %128 = vector.broadcast %127 : vector<1x256xf32> to vector<2x256xf32>
    %129 = arith.addf %126, %128 : vector<2x256xf32>
    %cst_58 = arith.constant 0.000000e+00 : f32
    %130 = vector.broadcast %cst_58 : f32 to vector<2x256xf32>
    %131 = arith.cmpf oge, %129, %130 : vector<2x256xf32>
    %cst_59 = arith.constant 0.00999999977 : f32
    %132 = vector.broadcast %cst_59 : f32 to vector<2x256xf32>
    %133 = arith.mulf %132, %129 : vector<2x256xf32>
    %134 = arith.select %131, %129, %133 : vector<2x256xi1>, vector<2x256xf32>
    %c0_60 = arith.constant 0 : index
    %c0_61 = arith.constant 0 : index
    %135 = vector.load %arg15[%c0_60, %c0_61] : memref<256x64xf32, #tpu.memory_space<vmem>>, vector<256x64xf32>
    %cst_62 = arith.constant dense<0.000000e+00> : vector<2x64xf32>
    %136 = tpu.matmul %134, %135, %cst_62 {dimension_numbers = #tpu.dot_dimension_numbers<[1], [0], [0], [1], [0, 0, 1, 1], [], []>} : vector<2x256xf32>, vector<256x64xf32>, vector<2x64xf32> -> vector<2x64xf32>
    %c0_63 = arith.constant 0 : index
    %c0_64 = arith.constant 0 : index
    %137 = vector.load %arg16[%c0_63, %c0_64] : memref<1x64xf32, #tpu.memory_space<vmem>>, vector<1x64xf32>
    %138 = vector.broadcast %137 : vector<1x64xf32> to vector<2x64xf32>
    %139 = arith.addf %136, %138 : vector<2x64xf32>
    %cst_65 = arith.constant 0.000000e+00 : f32
    %140 = vector.broadcast %cst_65 : f32 to vector<2x64xf32>
    %141 = arith.cmpf oge, %139, %140 : vector<2x64xf32>
    %cst_66 = arith.constant 0.00999999977 : f32
    %142 = vector.broadcast %cst_66 : f32 to vector<2x64xf32>
    %143 = arith.mulf %142, %139 : vector<2x64xf32>
    %144 = arith.select %141, %139, %143 : vector<2x64xi1>, vector<2x64xf32>
    %c0_67 = arith.constant 0 : index
    %c0_68 = arith.constant 0 : index
    %145 = vector.load %arg17[%c0_67, %c0_68] : memref<64x1xf32, #tpu.memory_space<vmem>>, vector<64x1xf32>
    %cst_69 = arith.constant dense<0.000000e+00> : vector<2x1xf32>
    %146 = tpu.matmul %144, %145, %cst_69 {dimension_numbers = #tpu.dot_dimension_numbers<[1], [0], [0], [1], [0, 0, 1, 1], [], []>} : vector<2x64xf32>, vector<64x1xf32>, vector<2x1xf32> -> vector<2x1xf32>
    %c0_70 = arith.constant 0 : index
    %c0_71 = arith.constant 0 : index
    %147 = vector.load %arg18[%c0_70, %c0_71] : memref<1x1xf32, #tpu.memory_space<vmem>>, vector<1x1xf32>
    %148 = vector.broadcast %147 : vector<1x1xf32> to vector<2x1xf32>
    %149 = arith.addf %146, %148 : vector<2x1xf32>
    %cst_72 = arith.constant 0.000000e+00 : f32
    %150 = vector.broadcast %cst_72 : f32 to vector<2x1xf32>
    %151 = arith.maximumf %149, %150 : vector<2x1xf32>
    %c0_73 = arith.constant 0 : index
    %c0_74 = arith.constant 0 : index
    %152 = vector.load %arg19[%c0_73, %c0_74] : memref<2x1xf32, #tpu.memory_space<vmem>>, vector<2x1xf32>
    tpu.vector_store %arg19[%c0_73, %c0_74], %151 {strides = array<i32>} : memref<2x1xf32, #tpu.memory_space<vmem>>, vector<2x1xf32>,
    return
  }
}

</mosaic_0001>

<bundles_post_ra>
// kernel: forward_pallas.1
= control target key start
LH: loop header
LB: loop body
LE: loop exit
PB: predicated region body
PF: predicated region fallthrough
CT: control target
= control target key end

     0   :  { %s4678_s0 = inlined_call_operand.vmem [shape: f32[2,10,32], index: 0, kind: input, shape index: {}]   ;;  %s4679_s1 = inlined_call_operand.hbm [shape: f32[2,3], index: 1, kind: input, shape index: {}]   ;;  %s4680_s2 = inlined_call_operand.hbm [shape: f32[96,32], index: 2, kind: input, shape index: {}]   ;;  %s4681_s3 = inlined_call_operand.hbm [shape: f32[1,32], index: 3, kind: input, shape index: {}]   ;;  %s4682_s4 = inlined_call_operand.hbm [shape: f32[1,32], index: 4, kind: input, shape index: {}]   ;;  %s4683_s5 = inlined_call_operand.hbm [shape: f32[32,64], index: 5, kind: input, shape index: {}]   ;;  %s4684_s6 = inlined_call_operand.hbm [shape: f32[24,24], index: 6, kind: input, shape index: {}]   ;;  %s4685_s7 = inlined_call_operand.hbm [shape: f32[1,24,32], index: 7, kind: input, shape index: {}]   ;;  %s4686_s8 = inlined_call_operand.hbm [shape: f32[3,32,32], index: 8, kind: input, shape index: {}]   ;;  %s4687_s9 = inlined_call_operand.hbm [shape: f32[3,1,32], index: 9, kind: input, shape index: {}]   ;;  %s4688_s10 = inlined_call_operand.hbm [shape: f32[32,32], index: 10, kind: input, shape index: {}]   ;;  %s4689_s11 = inlined_call_operand.hbm [shape: f32[1,32], index: 11, kind: input, shape index: {}]   ;;  %s4690_s12 = inlined_call_operand.hbm [shape: f32[256,256], index: 12, kind: input, shape index: {}]   ;;  %s4691_s13 = inlined_call_operand.hbm [shape: f32[3,256], index: 13, kind: input, shape index: {}]   ;;  %s4692_s14 = inlined_call_operand.hbm [shape: f32[1,256], index: 14, kind: input, shape index: {}]   ;;  %s4693_s15 = inlined_call_operand.vmem [shape: f32[256,64], index: 15, kind: input, shape index: {}]   ;;  %s4694_s16 = inlined_call_operand.vmem [shape: f32[1,64], index: 16, kind: input, shape index: {}]   ;;  %s4695_s17 = inlined_call_operand.vmem [shape: f32[64,1], index: 17, kind: input, shape index: {}]   ;;  %s4696_s18 = inlined_call_operand.<no memory space> [shape: f32[1,1], index: 18, kind: input, shape index: {}]   ;;  %s4697_s19 = inlined_call_operand.vmem [shape: f32[2,1], index: 19, kind: output, shape index: {}]  }
   0x1   :  { %4702 = sst [smem:[#allocation33_spill]] %s4678_s0  ;;  %v24_v0 = vstv %s4696_s18 }
   0x2   :  { %4703 = sst [smem:[#allocation34_spill]] %s4679_s1  ;;  %25 = vst [vmem:[#allocation2] sm:$0x1] %v24_v0 }
   0x3   :  { %4704 = sst [smem:[#allocation35_spill]] %s4680_s2 }
   0x4   :  { %4705 = sst [smem:[#allocation36_spill]] %s4681_s3 }
   0x5   :  { %4706 = sst [smem:[#allocation37_spill]] %s4697_s19 }
   0x6   :  { %26 = vsyncpa [#allocation4], 0 }
   0x7   :  { %27 = vsyncpa [#allocation6], 0 }
   0x8   :  { %28 = vsyncpa [#allocation9], 0 }
   0x9   :  { %29 = vsyncpa [#allocation12], 0 }
   0xa   :  { %30 = vsyncpa [#allocation15], 0 }
   0xb   :  { %31 = vsyncpa [#allocation18], 0 }
   0xc   :  { %32 = vsyncpa [#allocation21], 0 }
   0xd   :  { %33 = vsyncpa [#allocation24], 0  ;;  %s3990_s20 = smov [#allocation5]   ;;  %s4707_s2 = sld [smem:[#allocation35_spill]] }
   0xe   :  { %s51_s21 = sshll.u32 %s3990_s20, 4  ;;  %s52_s21 = int_to_ptr.vmem [resolvable:$true] %s51_s21 }
  0x13   :  { %s3666_s23 = scalar_lea.hbm %s4707_s2, 1536 }
  0x14   :  { %p3667_p0 = scmp.ne.s32.totalorder %s4707_s2, %s3666_s23  ;;  %p3670_p1 = scmp.lt.u32.totalorder %s3666_s23, %s4707_s2 }
  0x16   :  { %p3672_p2 = pnand %p3670_p1, %p3667_p0 }
  0x18   :  { %3675 = shalt.err (!%p3672_p2)
}
  0x19   :  { %s3676_s26 = scalar_lea.vmem %s52_s21, 1536  ;;  %p3681_p4 = scmp.lt.s32.totalorder %s52_s21, %s52_s21 }
  0x1a   :  { %p3677_p3 = scmp.ne.s32.totalorder %s52_s21, %s3676_s26  ;;  %p3682_p5 = scmp.lt.s32.totalorder %s3676_s26, %s3676_s26 }
  0x1c   :  { %p3683_p6 = por %p3682_p5, %p3681_p4 }
  0x1e   :  { %p3684_p7 = pnand %p3683_p6, %p3677_p3 }
  0x20   :  { %3687 = shalt.err (!%p3684_p7)
}
  0x21   :  { %s3991_s27 = smov 128   ;;  %s3992_s28 = smov 8  }
  0x22   :  { %57 = dma.hbm_to_vmem [thread:$0]  %s4707_s2, 1536, %s52_s21, [#allocation6], %s3991_s27, %s3991_s27, %s3992_s28  }
  0x23   :  { %s3993_s30 = smov [#allocation8]   ;;  %s3994_s1 = smov [#allocation11]  }
  0x24   :  { %s74_s20 = sshll.u32 %s3993_s30, 4  ;;  %s95_s22 = sshll.u32 %s3994_s1, 4  ;;  %s75_s20 = int_to_ptr.vmem [resolvable:$true] %s74_s20  ;;  %s96_s22 = int_to_ptr.vmem [resolvable:$true] %s95_s22 }
  0x25   :  { %s3688_s25 = scalar_lea.hbm %s4682_s4, 16 }
  0x26   :  { %p3689_p8 = scmp.ne.s32.totalorder %s4682_s4, %s3688_s25  ;;  %p3692_p9 = scmp.lt.u32.totalorder %s3688_s25, %s4682_s4 }
  0x28   :  { %p3694_p10 = pnand %p3692_p9, %p3689_p8 }
  0x2a   :  { %3697 = shalt.err (!%p3694_p10)
}
  0x2b   :  { %s3698_s21 = scalar_lea.vmem %s75_s20, 16  ;;  %s3702_s2 = scalar_lea.vmem %s75_s20, 32 }
  0x2c   :  { %p3699_p11 = scmp.ne.s32.totalorder %s75_s20, %s3698_s21  ;;  %p3703_p12 = scmp.lt.s32.totalorder %s75_s20, %s75_s20 }
  0x2d   :  { %p3704_p13 = scmp.lt.s32.totalorder %s3702_s2, %s3698_s21 }
  0x2f   :  { %p3705_p0 = por %p3704_p13, %p3703_p12 }
  0x31   :  { %p3706_p1 = pnand %p3705_p0, %p3699_p11 }
  0x33   :  { %3709 = shalt.err (!%p3706_p1)
}
  0x34   :  { %77 = dma.hbm_to_vmem [thread:$0]  %s4682_s4, 16, %s75_s20, [#allocation9]  }
  0x35   :  { %s3710_s19 = scalar_lea.hbm %s4684_s6, 384 }
  0x36   :  { %p3711_p2 = scmp.ne.s32.totalorder %s4684_s6, %s3710_s19  ;;  %p3714_p3 = scmp.lt.u32.totalorder %s3710_s19, %s4684_s6 }
  0x38   :  { %p3716_p4 = pnand %p3714_p3, %p3711_p2 }
  0x3a   :  { %3719 = shalt.err (!%p3716_p4)
}
  0x3b   :  { %s3720_s3 = scalar_lea.vmem %s96_s22, 384  ;;  %p3725_p6 = scmp.lt.s32.totalorder %s96_s22, %s96_s22 }
  0x3c   :  { %p3721_p5 = scmp.ne.s32.totalorder %s96_s22, %s3720_s3  ;;  %p3726_p7 = scmp.lt.s32.totalorder %s3720_s3, %s3720_s3 }
  0x3e   :  { %p3727_p8 = por %p3726_p7, %p3725_p6 }
  0x40   :  { %p3728_p9 = pnand %p3727_p8, %p3721_p5 }
  0x42   :  { %3731 = shalt.err (!%p3728_p9)
}
  0x43   :  { %101 = dma.hbm_to_vmem [thread:$0]  %s4684_s6, 384, %s96_s22, [#allocation12], %s3991_s27, %s3991_s27, %s3992_s28  }
  0x44   :  { %s3995_s26 = smov [#allocation14]   ;;  %s3996_s2 = smov [#allocation17]  }
  0x45   :  { %s119_s21 = sshll.u32 %s3995_s26, 4  ;;  %s143_s29 = sshll.u32 %s3996_s2, 4  ;;  %s120_s21 = int_to_ptr.vmem [resolvable:$true] %s119_s21  ;;  %s144_s29 = int_to_ptr.vmem [resolvable:$true] %s143_s29 }
  0x46   :  { %s3732_s1 = scalar_lea.hbm %s4686_s8, 1536 }
  0x47   :  { %p3733_p10 = scmp.ne.s32.totalorder %s4686_s8, %s3732_s1  ;;  %p3736_p11 = scmp.lt.u32.totalorder %s3732_s1, %s4686_s8 }
  0x49   :  { %p3738_p12 = pnand %p3736_p11, %p3733_p10 }
  0x4b   :  { %3741 = shalt.err (!%p3738_p12)
}
  0x4c   :  { %s3742_s6 = scalar_lea.vmem %s120_s21, 1536  ;;  %p3747_p0 = scmp.lt.s32.totalorder %s120_s21, %s120_s21 }
  0x4d   :  { %p3743_p13 = scmp.ne.s32.totalorder %s120_s21, %s3742_s6  ;;  %p3748_p1 = scmp.lt.s32.totalorder %s3742_s6, %s3742_s6 }
  0x4f   :  { %p3749_p2 = por %p3748_p1, %p3747_p0 }
  0x51   :  { %p3750_p3 = pnand %p3749_p2, %p3743_p13 }
  0x53   :  { %3753 = shalt.err (!%p3750_p3)
}
  0x54   :  { %125 = dma.hbm_to_vmem [thread:$0]  %s4686_s8, 1536, %s120_s21, [#allocation15], %s3991_s27, %s3991_s27, %s3992_s28  }
  0x55   :  { %s3754_s20 = scalar_lea.hbm %s4688_s10, 512 }
  0x56   :  { %p3755_p4 = scmp.ne.s32.totalorder %s4688_s10, %s3754_s20  ;;  %p3758_p5 = scmp.lt.u32.totalorder %s3754_s20, %s4688_s10 }
  0x58   :  { %p3760_p6 = pnand %p3758_p5, %p3755_p4 }
  0x5a   :  { %3763 = shalt.err (!%p3760_p6)
}
  0x5b   :  { %s3764_s1 = scalar_lea.vmem %s144_s29, 512  ;;  %p3769_p8 = scmp.lt.s32.totalorder %s144_s29, %s144_s29 }
  0x5c   :  { %p3765_p7 = scmp.ne.s32.totalorder %s144_s29, %s3764_s1  ;;  %p3770_p9 = scmp.lt.s32.totalorder %s3764_s1, %s3764_s1 }
  0x5e   :  { %p3771_p10 = por %p3770_p9, %p3769_p8 }
  0x60   :  { %p3772_p11 = pnand %p3771_p10, %p3765_p7 }
  0x62   :  { %3775 = shalt.err (!%p3772_p11)
}
  0x63   :  { %149 = dma.hbm_to_vmem [thread:$0]  %s4688_s10, 512, %s144_s29, [#allocation18], %s3991_s27, %s3991_s27, %s3992_s28  }
  0x64   :  { %s3997_s19 = smov [#allocation20]   ;;  %s3998_s24 = smov [#allocation3]  }
  0x65   :  { %s165_s23 = sshll.u32 %s3997_s19, 4  ;;  %s42_s25 = sshll.u32 %s3998_s24, 4  ;;  %s166_s23 = int_to_ptr.vmem [resolvable:$true] %s165_s23  ;;  %s43_s25 = int_to_ptr.vmem [resolvable:$true] %s42_s25 }
  0x66   :  { %s3776_s18 = scalar_lea.hbm %s4690_s12, 8192 }
  0x67   :  { %p3777_p12 = scmp.ne.s32.totalorder %s4690_s12, %s3776_s18  ;;  %p3780_p13 = scmp.lt.u32.totalorder %s3776_s18, %s4690_s12 }
  0x69   :  { %p3782_p0 = pnand %p3780_p13, %p3777_p12 }
  0x6b   :  { %3785 = shalt.err (!%p3782_p0)
}
  0x6c   :  { %s3786_s10 = scalar_lea.vmem %s166_s23, 8192  ;;  %p3791_p2 = scmp.lt.s32.totalorder %s166_s23, %s166_s23 }
  0x6d   :  { %p3787_p1 = scmp.ne.s32.totalorder %s166_s23, %s3786_s10  ;;  %p3792_p3 = scmp.lt.s32.totalorder %s3786_s10, %s3786_s10 }
  0x6f   :  { %p3793_p4 = por %p3792_p3, %p3791_p2 }
  0x71   :  { %p3794_p5 = pnand %p3793_p4, %p3787_p1 }
  0x73   :  { %3797 = shalt.err (!%p3794_p5)
}
  0x74   :  { %s3999_s29 = smov 256   ;;  %s4000_s2 = smov 16  }
  0x75   :  { %171 = dma.hbm_to_vmem [thread:$0]  %s4690_s12, 8192, %s166_s23, [#allocation21], %s3999_s29, %s3999_s29, %s4000_s2  }
  0x76   :  { %s4708_s21 = sld [smem:[#allocation34_spill]] }
  0x7c   :  { %s3798_s19 = scalar_lea.hbm %s4708_s21, 32 }
  0x7d   :  { %p3799_p6 = scmp.ne.s32.totalorder %s4708_s21, %s3798_s19  ;;  %p3802_p7 = scmp.lt.u32.totalorder %s3798_s19, %s4708_s21 }
  0x7f   :  { %p3804_p8 = pnand %p3802_p7, %p3799_p6 }
  0x81   :  { %3807 = shalt.err (!%p3804_p8)
}
  0x82   :  { %s3808_s3 = scalar_lea.vmem %s43_s25, 32  ;;  %p3813_p10 = scmp.lt.s32.totalorder %s43_s25, %s43_s25 }
  0x83   :  { %p3809_p9 = scmp.ne.s32.totalorder %s43_s25, %s3808_s3  ;;  %p3814_p11 = scmp.lt.s32.totalorder %s3808_s3, %s3808_s3 }
  0x85   :  { %p3815_p12 = por %p3814_p11, %p3813_p10 }
  0x87   :  { %p3816_p13 = pnand %p3815_p12, %p3809_p9 }
  0x89   :  { %3819 = shalt.err (!%p3816_p13)
}
  0x8a   :  { %45 = dma.hbm_to_vmem [thread:$0]  %s4708_s21, 32, %s43_s25, [#allocation4]  }
  0x8b   :  { %s4001_s4 = smov [#allocation7]   ;;  %s4002_s26 = smov [#allocation10]  }
  0x8c   :  { %s64_s20 = sshll.u32 %s4001_s4, 4  ;;  %s83_s10 = sshll.u32 %s4002_s26, 4  ;;  %s65_s20 = int_to_ptr.vmem [resolvable:$true] %s64_s20  ;;  %s84_s10 = int_to_ptr.vmem [resolvable:$true] %s83_s10 }
  0x8d   :  { %s4709_s30 = sld [smem:[#allocation36_spill]] }
  0x93   :  { %s3820_s1 = scalar_lea.hbm %s4709_s30, 16 }
  0x94   :  { %p3821_p0 = scmp.ne.s32.totalorder %s4709_s30, %s3820_s1  ;;  %p3824_p1 = scmp.lt.u32.totalorder %s3820_s1, %s4709_s30 }
  0x96   :  { %p3826_p2 = pnand %p3824_p1, %p3821_p0 }
  0x98   :  { %3829 = shalt.err (!%p3826_p2)
}
  0x99   :  { %s3830_s25 = scalar_lea.vmem %s65_s20, 16  ;;  %s3834_s21 = scalar_lea.vmem %s65_s20, 32 }
  0x9a   :  { %p3831_p3 = scmp.ne.s32.totalorder %s65_s20, %s3830_s25  ;;  %p3835_p4 = scmp.lt.s32.totalorder %s65_s20, %s65_s20 }
  0x9b   :  { %p3836_p5 = scmp.lt.s32.totalorder %s3834_s21, %s3830_s25 }
  0x9d   :  { %p3837_p6 = por %p3836_p5, %p3835_p4 }
  0x9f   :  { %p3838_p7 = pnand %p3837_p6, %p3831_p3 }
  0xa1   :  { %3841 = shalt.err (!%p3838_p7)
}
  0xa2   :  { %67 = dma.hbm_to_vmem [thread:$0]  %s4709_s30, 16, %s65_s20, [#allocation6]  }
  0xa3   :  { %s3842_s23 = scalar_lea.hbm %s4683_s5, 512 }
  0xa4   :  { %p3843_p8 = scmp.ne.s32.totalorder %s4683_s5, %s3842_s23  ;;  %p3846_p9 = scmp.lt.u32.totalorder %s3842_s23, %s4683_s5 }
  0xa6   :  { %p3848_p10 = pnand %p3846_p9, %p3843_p8 }
  0xa8   :  { %3851 = shalt.err (!%p3848_p10)
}
  0xa9   :  { %s3852_s1 = scalar_lea.vmem %s84_s10, 512  ;;  %p3857_p12 = scmp.lt.s32.totalorder %s84_s10, %s84_s10 }
  0xaa   :  { %p3853_p11 = scmp.ne.s32.totalorder %s84_s10, %s3852_s1  ;;  %p3858_p13 = scmp.lt.s32.totalorder %s3852_s1, %s3852_s1 }
  0xac   :  { %p3859_p0 = por %p3858_p13, %p3857_p12 }
  0xae   :  { %p3860_p1 = pnand %p3859_p0, %p3853_p11 }
  0xb0   :  { %3863 = shalt.err (!%p3860_p1)
}
  0xb1   :  { %89 = dma.hbm_to_vmem [thread:$0]  %s4683_s5, 512, %s84_s10, [#allocation9], %s3991_s27, %s3991_s27, %s3992_s28  }
  0xb2   :  { %s4003_s8 = smov [#allocation13]   ;;  %s4004_s24 = smov [#allocation16]  }
  0xb3   :  { %s107_s19 = sshll.u32 %s4003_s8, 4  ;;  %s131_s6 = sshll.u32 %s4004_s24, 4  ;;  %s108_s19 = int_to_ptr.vmem [resolvable:$true] %s107_s19  ;;  %s132_s6 = int_to_ptr.vmem [resolvable:$true] %s131_s6 }
  0xb4   :  { %s3864_s22 = scalar_lea.hbm %s4685_s7, 384 }
  0xb5   :  { %p3865_p2 = scmp.ne.s32.totalorder %s4685_s7, %s3864_s22  ;;  %p3868_p3 = scmp.lt.u32.totalorder %s3864_s22, %s4685_s7 }
  0xb7   :  { %p3870_p4 = pnand %p3868_p3, %p3865_p2 }
  0xb9   :  { %3873 = shalt.err (!%p3870_p4)
}
  0xba   :  { %s3874_s5 = scalar_lea.vmem %s108_s19, 384  ;;  %p3879_p6 = scmp.lt.s32.totalorder %s108_s19, %s108_s19 }
  0xbb   :  { %p3875_p5 = scmp.ne.s32.totalorder %s108_s19, %s3874_s5  ;;  %p3880_p7 = scmp.lt.s32.totalorder %s3874_s5, %s3874_s5 }
  0xbd   :  { %p3881_p8 = por %p3880_p7, %p3879_p6 }
  0xbf   :  { %p3882_p9 = pnand %p3881_p8, %p3875_p5 }
  0xc1   :  { %3885 = shalt.err (!%p3882_p9)
}
  0xc2   :  { %113 = dma.hbm_to_vmem [thread:$0]  %s4685_s7, 384, %s108_s19, [#allocation12], %s3991_s27, %s3991_s27, %s3992_s28  }
  0xc3   :  { %s3886_s0 = scalar_lea.hbm %s4687_s9, 48 }
  0xc4   :  { %p3887_p10 = scmp.ne.s32.totalorder %s4687_s9, %s3886_s0  ;;  %p3890_p11 = scmp.lt.u32.totalorder %s3886_s0, %s4687_s9 }
  0xc6   :  { %p3892_p12 = pnand %p3890_p11, %p3887_p10 }
  0xc8   :  { %3895 = shalt.err (!%p3892_p12)
}
  0xc9   :  { %s3896_s24 = scalar_lea.vmem %s132_s6, 48  ;;  %s3900_s25 = scalar_lea.vmem %s132_s6, 64 }
  0xca   :  { %p3897_p13 = scmp.ne.s32.totalorder %s132_s6, %s3896_s24  ;;  %p3901_p0 = scmp.lt.s32.totalorder %s132_s6, %s132_s6 }
  0xcb   :  { %p3902_p1 = scmp.lt.s32.totalorder %s3900_s25, %s3896_s24 }
  0xcd   :  { %p3903_p2 = por %p3902_p1, %p3901_p0 }
  0xcf   :  { %p3904_p3 = pnand %p3903_p2, %p3897_p13 }
  0xd1   :  { %3907 = shalt.err (!%p3904_p3)
}
  0xd2   :  { %s4005_s7 = smov 1   ;;  %s4006_s21 = smov [#allocation19]  }
  0xd3   :  { %137 = dma.hbm_to_vmem [thread:$0]  %s4687_s9, 48, %s132_s6, [#allocation15], %s4000_s2, %s4000_s2, %s4005_s7  }
  0xd4   :  { %s156_s22 = sshll.u32 %s4006_s21, 4  ;;  %s4007_s18 = smov [#allocation22]   ;;  %s157_s22 = int_to_ptr.vmem [resolvable:$true] %s156_s22 }
  0xd5   :  { %s178_s3 = sshll.u32 %s4007_s18, 4  ;;  %s3908_s5 = scalar_lea.hbm %s4689_s11, 16  ;;  %s179_s3 = int_to_ptr.vmem [resolvable:$true] %s178_s3 }
  0xd6   :  { %p3909_p4 = scmp.ne.s32.totalorder %s4689_s11, %s3908_s5  ;;  %p3912_p5 = scmp.lt.u32.totalorder %s3908_s5, %s4689_s11 }
  0xd8   :  { %p3914_p6 = pnand %p3912_p5, %p3909_p4 }
  0xda   :  { %3917 = shalt.err (!%p3914_p6)
}
  0xdb   :  { %s3918_s9 = scalar_lea.vmem %s157_s22, 16  ;;  %s3922_s6 = scalar_lea.vmem %s157_s22, 32 }
  0xdc   :  { %p3919_p7 = scmp.ne.s32.totalorder %s157_s22, %s3918_s9  ;;  %p3923_p8 = scmp.lt.s32.totalorder %s157_s22, %s157_s22 }
  0xdd   :  { %p3924_p9 = scmp.lt.s32.totalorder %s3922_s6, %s3918_s9 }
  0xdf   :  { %p3925_p10 = por %p3924_p9, %p3923_p8 }
  0xe1   :  { %p3926_p11 = pnand %p3925_p10, %p3919_p7 }
  0xe3   :  { %3929 = shalt.err (!%p3926_p11)
}
  0xe4   :  { %159 = dma.hbm_to_vmem [thread:$0]  %s4689_s11, 16, %s157_s22, [#allocation18]  }
  0xe5   :  { %s3930_s8 = scalar_lea.hbm %s4691_s13, 128 }
  0xe6   :  { %p3931_p12 = scmp.ne.s32.totalorder %s4691_s13, %s3930_s8  ;;  %p3934_p13 = scmp.lt.u32.totalorder %s3930_s8, %s4691_s13 }
  0xe8   :  { %p3936_p0 = pnand %p3934_p13, %p3931_p12 }
  0xea   :  { %3939 = shalt.err (!%p3936_p0)
}
  0xeb   :  { %s3940_s19 = scalar_lea.vmem %s179_s3, 128  ;;  %p3945_p2 = scmp.lt.s32.totalorder %s179_s3, %s179_s3 }
  0xec   :  { %p3941_p1 = scmp.ne.s32.totalorder %s179_s3, %s3940_s19  ;;  %p3946_p3 = scmp.lt.s32.totalorder %s3940_s19, %s3940_s19 }
  0xee   :  { %p3947_p4 = por %p3946_p3, %p3945_p2 }
  0xf0   :  { %p3948_p5 = pnand %p3947_p4, %p3941_p1 }
  0xf2   :  { %3951 = shalt.err (!%p3948_p5)
}
  0xf3   :  { %181 = dma.hbm_to_vmem [thread:$0]  %s4691_s13, 128, %s179_s3, [#allocation21]  }
  0xf4   :  { %s4008_s22 = smov [#allocation23]   ;;  %s3952_s5 = scalar_lea.hbm %s4692_s14, 32 }
  0xf5   :  { %s188_s18 = sshll.u32 %s4008_s22, 4  ;;  %p3953_p6 = scmp.ne.s32.totalorder %s4692_s14, %s3952_s5  ;;  %s189_s18 = int_to_ptr.vmem [resolvable:$true] %s188_s18 }
  0xf6   :  { %p3956_p7 = scmp.lt.u32.totalorder %s3952_s5, %s4692_s14 }
  0xf8   :  { %p3958_p8 = pnand %p3956_p7, %p3953_p6 }
  0xfa   :  { %3961 = shalt.err (!%p3958_p8)
}
  0xfb   :  { %s3962_s9 = scalar_lea.vmem %s189_s18, 32  ;;  %p3967_p10 = scmp.lt.s32.totalorder %s189_s18, %s189_s18 }
  0xfc   :  { %p3963_p9 = scmp.ne.s32.totalorder %s189_s18, %s3962_s9  ;;  %p3968_p11 = scmp.lt.s32.totalorder %s3962_s9, %s3962_s9 }
  0xfe   :  { %p3969_p12 = por %p3968_p11, %p3967_p10 }
 0x100   :  { %p3970_p13 = pnand %p3969_p12, %p3963_p9 }
 0x102   :  { %3973 = shalt.err (!%p3970_p13)
}
 0x103   :  { %191 = dma.hbm_to_vmem [thread:$0]  %s4692_s14, 32, %s189_s18, [#allocation24]  }
 0x104   :  { %3974 = dma.done.wait [#allocation4], 32  }
 0x105   :  { %3975 = vsyncadd [#allocation4], 4294967264 }
 0x106   :  { %3976 = dma.done.wait [#allocation6], 1552  }
 0x107   :  { %3977 = vsyncadd [#allocation6], 4294965744 }
 0x108   :  { %3978 = dma.done.wait [#allocation9], 528  }
 0x109   :  { %3979 = vsyncadd [#allocation9], 4294966768 }
 0x10a   :  { %3980 = dma.done.wait [#allocation12], 768  }
 0x10b   :  { %3981 = vsyncadd [#allocation12], 4294966528 }
 0x10c   :  { %3982 = dma.done.wait [#allocation15], 1584  }
 0x10d   :  { %3983 = vsyncadd [#allocation15], 4294965712 }
 0x10e   :  { %3984 = dma.done.wait [#allocation18], 528  }
 0x10f   :  { %3985 = vsyncadd [#allocation18], 4294966768 }
 0x110   :  { %3986 = dma.done.wait [#allocation21], 8320  }
 0x111   :  { %3987 = vsyncadd [#allocation21], 4294958976 }
 0x112   :  { %3988 = dma.done.wait [#allocation24], 32  }
 0x113   :  { %3989 = vsyncadd [#allocation24], 4294967264  ;;  %vm250_vm0 = vcmask 1046528   ;;  %s4710_s14 = sld [smem:[#allocation33_spill]]  ;;  %vm263_vm1 = vcmask 1045504   ;;  %v282_v13 = vld [vmem:[#allocation5] sm:$0xff] }
 0x114   :  { %v283_v14 = vld [vmem:[#allocation5 + $0x8] sm:$0xff]  ;;  %v284_v18 = vld [vmem:[#allocation5 + $0x10] sm:$0xff]  ;;  %v285_v19 = vld [vmem:[#allocation5 + $0x18] sm:$0xff]  ;;  %s4009_s7 = smov 32   ;;  %s4010_s27 = smov 64   ;;  %vm276_vm2 = vcmask 261120  }
 0x115   :  { %v3391_v17 = vpack.c.bf16 %v283_v14, %v282_v13  ;;  %v3395_v20 = vpack.c.bf16 %v285_v19, %v284_v18  ;;  %v286_v21 = vld [vmem:[#allocation5 + $0x20] sm:$0xff]  ;;  %v287_v22 = vld [vmem:[#allocation5 + $0x28] sm:$0xff]  ;;  %v402_v28 = vld [vmem:[#allocation10 + $0x10] sm:$0xff]  ;;  %s4011_s19 = smov 96   ;;  %vm279_vm3 = vcmask 523264   ;;  %vm294_vm4 = vcmask 785408  }
 0x116   :  { %v400_v25 = vld [vmem:[#allocation10] sm:$0xff]  ;;  %v401_v26 = vld [vmem:[#allocation10 + $0x8] sm:$0xff]  ;;  %v3399_v27 = vpack.c.bf16 %v287_v22, %v286_v21  ;;  %v403_v29 = vld [vmem:[#allocation10 + $0x18] sm:$0xff]  ;;  %vm4013_vm7 = vmmov 0   ;;  %vm582_vm8 = vcmask 195584   ;;  %s4015_s11 = smov 120  }
 0x117   :  { %3392 = vmatprep.subr.bf16.mxu0 %v3391_v17  ;;  %v288_v30 = vld [vmem:[#allocation5 + $0x30] sm:$0xff]  ;;  %v289_v31 = vld [vmem:[#allocation5 + $0x38] sm:$0xff]  ;;  %v3608_v32 = vpack.i.bf16 %v401_v26, %v400_v25  ;;  %v3613_v33 = vpack.i.bf16 %v403_v29, %v402_v28  ;;  %v290_v35 = vld [vmem:[#allocation5 + $0x40] sm:$0xff]  ;;  %v3415_v52 = vpack.c.bf16 %v401_v26, %v400_v25  ;;  %v3419_v58 = vpack.c.bf16 %v403_v29, %v402_v28  ;;  %s4016_s21 = smov 112   ;;  %s4017_s22 = smov 104  }
 0x118   :  { %3394 = vmatpush3.bf16.msra.mxu0 %v3391_v17  ;;  %v3403_v34 = vpack.c.bf16 %v289_v31, %v288_v30  ;;  %v291_v36 = vld [vmem:[#allocation5 + $0x48] sm:$0xff]  ;;  %v292_v38 = vld [vmem:[#allocation5 + $0x50] sm:$0xff]  ;;  %v293_v39 = vld [vmem:[#allocation5 + $0x58] sm:$0xff]  ;;  %vm1080_vm9 = vcmask 64512   ;;  %s4018_s18 = smov 24   ;;  %vm2371_vm10 = vcmask 130048  }
 0x119   :  { %v4314_v1 = vld [vmem:[%s4710_s14] sm:$0xff]  ;;  %v243_v2 = vld [vmem:[%s4710_s14 + $0x8] sm:$0x3]  ;;  %v4322_v3 = vld [vmem:[%s4710_s14 + $0x10] sm:$0xff]  ;;  %3396 = vmatprep.subr.bf16.mxu0 %v3395_v20  ;;  %v3407_v37 = vpack.c.bf16 %v291_v36, %v290_v35  ;;  %v3411_v40 = vpack.c.bf16 %v293_v39, %v292_v38  ;;  %vm2593_vm11 = vcmask 1042432   ;;  %vm2589_vm12 = vcmask 23552  }
 0x11a   :  { %v251_v4 = vrot.slane %v4314_v1, 1  ;;  %v252_v5 = vrot.slane %v243_v2, 1  ;;  %v264_v6 = vrot.slane %v4314_v1, 2  ;;  %v265_v7 = vrot.slane %v243_v2, 2  ;;  %v245_v8 = vld [vmem:[%s4710_s14 + $0x18] sm:$0x3] }
 0x11b   :  { %v254_v9 = vrot.slane %v4322_v3, 1  ;;  %v255_v10 = vrot.slane %v245_v8, 1  ;;  %v267_v11 = vrot.slane %v4322_v3, 2  ;;  %v268_v12 = vrot.slane %v245_v8, 2  ;;  %v2977_v59 = vld [vmem:[#allocation7] ss:$0 sm:$0xff] }
 0x11c   :  { %v253_v15 = vsel %vm250_vm0, %v251_v4, %v252_v5  ;;  %v266_v16 = vsel %vm263_vm1, %v264_v6, %v265_v7  ;;  %3398 = vmatpush3.bf16.msra.mxu0 %v3395_v20  ;;  %v2978_v61 = vld [vmem:[#allocation8] ss:$0 sm:$0xff]  ;;  %v4012_v7 = vmov 0.0|0.0   ;;  %v4014_v8 = vmov 0.0   ;;  %v576_v17 = vld [vmem:[#allocation11] sm:$0xff]  ;;  %v755_v19 = vld [vmem:[#allocation14 + $0x18] sm:$0xff] }
 0x11d   :  { %257 = vrot.lane.b32.xlu0 %v253_v15, %s4009_s7  ;;  %270 = vrot.lane.b32.xlu1 %v266_v16, %s4010_s27  ;;  %v256_v23 = vsel %vm250_vm0, %v254_v9, %v255_v10  ;;  %v269_v24 = vsel %vm263_vm1, %v267_v11, %v268_v12  ;;  %v752_v15 = vld [vmem:[#allocation14] sm:$0xff]  ;;  %v753_v16 = vld [vmem:[#allocation14 + $0x8] sm:$0xff]  ;;  %v754_v18 = vld [vmem:[#allocation14 + $0x10] sm:$0xff]  ;;  %vm2473_vm13 = vcmask 1041409   ;;  %vm2961_vm1 = vcmask 1024  }
 0x11e   :  { %3400 = vmatprep.subr.bf16.mxu0 %v3399_v27  ;;  %v3437_v20 = vpack.c.bf16 %v753_v16, %v752_v15  ;;  %v3441_v21 = vpack.c.bf16 %v755_v19, %v754_v18  ;;  %v577_v22 = vld [vmem:[#allocation11 + $0x8] sm:$0xff]  ;;  %v846_v25 = vld [vmem:[#allocation14 + $0x28] sm:$0xff]  ;;  %v939_v30 = vld [vmem:[#allocation14 + $0x40] sm:$0xff] }
 0x11f   :  { %v848_v28 = vld [vmem:[#allocation14 + $0x38] sm:$0xff]  ;;  %v940_v31 = vld [vmem:[#allocation14 + $0x48] sm:$0xff]  ;;  %v941_v35 = vld [vmem:[#allocation14 + $0x50] sm:$0xff] }
 0x120   :  { %3402 = vmatpush3.bf16.msra.mxu0 %v3399_v27  ;;  %v847_v27 = vld [vmem:[#allocation14 + $0x30] sm:$0xff]  ;;  %v942_v36 = vld [vmem:[#allocation14 + $0x58] sm:$0xff] }
 0x121   :  { %259 = vrot.lane.b32.xlu0 %v256_v23, %s4009_s7  ;;  %272 = vrot.lane.b32.xlu1 %v269_v24, %s4010_s27  ;;  %v578_v23 = vld [vmem:[#allocation11 + $0x10] sm:$0xff]  ;;  %v3449_v29 = vpack.c.bf16 %v848_v28, %v847_v27 }
 0x122   :  { %3404 = vmatprep.subr.bf16.mxu0 %v3403_v34  ;;  %v845_v24 = vld [vmem:[#allocation14 + $0x20] sm:$0xff] }
 0x123   :  { %v3445_v26 = vpack.c.bf16 %v846_v25, %v845_v24 }
 0x124   :  { %3406 = vmatpush3.bf16.msra.mxu0 %v3403_v34 }
 0x125   :  { %3609 = vrot.lane.b32.xlu0 %v3608_v32, %s4011_s19  ;;  %3614 = vrot.lane.b32.xlu1 %v3613_v33, %s4011_s19  ;;  %v3453_v32 = vpack.c.bf16 %v940_v31, %v939_v30  ;;  %v579_v33 = vld [vmem:[#allocation13] sm:$0xff] }
 0x126   :  { %3408 = vmatprep.subr.bf16.mxu0 %v3407_v37 }
 0x128   :  { %3410 = vmatpush3.bf16.msra.mxu0 %v3407_v37 }
 0x129   :  { %3412 = vmatprep.subr.bf16.mxu0 %v3411_v40 }
 0x12c   :  { %3414 = vmatpush3.bf16.msra.mxu0 %v3411_v40 }
 0x12d   :  { %3416 = vmatprep.subr.bf16.mxu0 %v3415_v52 }
 0x18f   :  { %v258_v41 = vpop.permute.xlu0 %257  ;;  %v271_v42 = vpop.permute.xlu1 %270 }
 0x190   :  { %v277_v43 = vsel %vm276_vm2, %v4314_v1, %v258_v41 }
 0x191   :  { %v280_v44 = vsel %vm279_vm3, %v277_v43, %v271_v42  ;;  %v580_v42 = vld [vmem:[#allocation13 + $0x8] sm:$0xff]  ;;  %v3457_v43 = vpack.c.bf16 %v942_v36, %v941_v35 }
 0x192   :  { %3193 = vmatprep.mubr.msk.f32.mxu0 %vm294_vm4, %v280_v44 }
 0x193   :  { %v260_v45 = vpop.permute.xlu0 %259  ;;  %v273_v46 = vpop.permute.xlu1 %272 }
 0x194   :  { %v278_v47 = vsel %vm276_vm2, %v4322_v3, %v260_v45 }
 0x195   :  { %v281_v48 = vsel %vm279_vm3, %v278_v47, %v273_v46 }
 0x196   :  { %3194 = vmatmul.mubr.msk.f32.vlgmr.msra.gmra.mrb[0].mxu0 %vm294_vm4, %v281_v48 }
 0x197   :  { %v3610_v49 = vpop.permute.xlu0 %3609  ;;  %v3615_v54 = vpop.permute.xlu1 %3614  ;;  %3418 = vmatpush3.bf16.msra.mxu0 %v3415_v52 }
 0x198   :  { %v3612_v50 = vunpack.i.h.bf16 %v3610_v49  ;;  %v3611_v51 = vunpack.i.l.bf16 %v3610_v49  ;;  %v3617_v55 = vunpack.i.h.bf16 %v3615_v54  ;;  %v3616_v56 = vunpack.i.l.bf16 %v3615_v54  ;;  %3420 = vmatprep.subr.bf16.mxu0 %v3419_v58 }
 0x19a   :  { %v3423_v53 = vpack.c.bf16 %v3612_v50, %v3611_v51  ;;  %v3427_v57 = vpack.c.bf16 %v3617_v55, %v3616_v56  ;;  %v581_v50 = vld [vmem:[#allocation13 + $0x10] sm:$0xff] }
 0x19b   :  { %3422 = vmatpush3.bf16.msra.mxu0 %v3419_v58 }
 0x19c   :  { %3424 = vmatprep.subr.bf16.mxu1 %v3423_v53  ;;  %3434 = vmatprep.subr.bf16.mxu0 %v4012_v7 }
 0x19d   :  { %3426 = vmatpush3.bf16.msra.mxu1 %v3423_v53 }
 0x19e   :  { %3428 = vmatprep.subr.bf16.mxu1 %v3427_v57 }
 0x1a1   :  { %3430 = vmatpush3.bf16.msra.mxu1 %v3427_v57  ;;  %v2989_v57 = vld [vmem:[#allocation16] ss:$0 sm:$0xff] }
 0x1a2   :  { %3431 = vmatprep.subr.bf16.mxu1 %v4012_v7 }
 0x269   :  { %v3195_v60 = vpop.f32.mrb[0].mxu0 }
 0x26a   :  { %v384_v62 = vmul.f32 %v3195_v60, %v2977_v59  ;;  %v367_v63 = vpop.f32.mrb[1].mxu0 }
 0x26b   :  { %v383_v0 = vmul.f32 %v2977_v59, %v367_v63 }
 0x26c   :  { %v393_v1 = vadd.f32 %v2978_v61, %v384_v62  ;;  %v2992_v62 = vld [vmem:[#allocation16 + $0x1] ss:$0 sm:$0xff] }
 0x26d   :  { %v392_v2 = vadd.f32 %v2978_v61, %v383_v0 }
 0x26e   :  { %v397_v3 = vmul.f32 0.01, %v393_v1  ;;  %vm395_vm5 = vcmp.ge.f32.partialorder %v393_v1, 0.0 }
 0x26f   :  { %v396_v4 = vmul.f32 0.01, %v392_v2  ;;  %vm394_vm6 = vcmp.ge.f32.partialorder %v392_v2, 0.0 }
 0x270   :  { %v4355_v6 = vsel %vm395_vm5, %v393_v1, %v397_v3 }
 0x271   :  { %v4349_v5 = vsel %vm394_vm6, %v392_v2, %v396_v4 }
 0x272   :  { %3204 = vmatprep.mubr.msk.f32.mxu0 %vm276_vm2, %v4349_v5  ;;  %3215 = vmatprep.mubr.msk.f32.mxu1 %vm276_vm2, %v4349_v5 }
 0x273   :  { %3205 = vmatmul.mubr.msk.f32.vlgmr.msra.gmra.mrb[2].mxu0 %vm276_vm2, %v4355_v6  ;;  %3216 = vmatmul.mubr.msk.f32.vlgmr.msra.gmra.mrb[0].mxu1 %vm276_vm2, %v4355_v6 }
 0x274   :  { %3224 = vmatprep.mubr.msk.f32.mxu1 %vm4013_vm7, %v4014_v8  ;;  %3239 = vmatprep.mubr.msk.f32.mxu0 %vm4013_vm7, %v4014_v8 }
 0x346   :  { %v3206_v9 = vpop.f32.mrb[2].mxu0  ;;  %v3217_v10 = vpop.f32.mrb[0].mxu1 }
 0x347   :  { %v3435_v11 = vpack.c.bf16 %v4355_v6, %v3206_v9  ;;  %v476_v12 = vpop.f32.mrb[3].mxu0  ;;  %v567_v13 = vpop.f32.mrb[1].mxu1 }
 0x348   :  { %v3432_v14 = vpack.c.bf16 %v4349_v5, %v476_v12 }
 0x349   :  { %3436 = vmatpush3.bf16.msra.mxu0 %v3435_v11 }
 0x34a   :  { %3433 = vmatpush3.bf16.msra.mxu1 %v3432_v14  ;;  %3237 = vmatprep.subr.mxu0 %v4014_v8 }
 0x34b   :  { %3222 = vmatprep.subr.mxu1 %v4014_v8 }
 0x34d   :  { %3238 = vmatpush3.msra.mxu0 %v3217_v10 }
 0x34e   :  { %3223 = vmatpush3.msra.mxu1 %v567_v13  ;;  %3240 = vmatmul.mubr.msk.f32.vlgmr.msra.gmra.mrb[4].mxu0 %vm582_vm8, %v576_v17 }
 0x34f   :  { %3225 = vmatmul.mubr.msk.f32.vlgmr.msra.gmra.mrb[2].mxu1 %vm582_vm8, %v576_v17  ;;  %3242 = vmatprep.mubr.msk.f32.mxu0 %vm4013_vm7, %v4014_v8  ;;  %v2995_v17 = vld [vmem:[#allocation16 + $0x2] ss:$0 sm:$0xff] }
 0x350   :  { %3227 = vmatprep.mubr.msk.f32.mxu1 %vm4013_vm7, %v4014_v8  ;;  %3438 = vmatprep.subr.bf16.mxu1 %v3437_v20 }
 0x351   :  { %3440 = vmatpush3.bf16.msra.mxu1 %v3437_v20  ;;  %3446 = vmatprep.subr.bf16.mxu0 %v3445_v26 }
 0x352   :  { %3243 = vmatmul.mubr.msk.f32.gmra.mrb[6].mxu0 %vm582_vm8, %v577_v22  ;;  %3442 = vmatprep.subr.bf16.mxu1 %v3441_v21 }
 0x353   :  { %3228 = vmatmul.mubr.msk.f32.gmra.mrb[4].mxu1 %vm582_vm8, %v577_v22  ;;  %3245 = vmatprep.mubr.msk.f32.mxu0 %vm4013_vm7, %v4014_v8 }
 0x354   :  { %3230 = vmatprep.mubr.msk.f32.mxu1 %vm4013_vm7, %v4014_v8  ;;  %3448 = vmatpush3.bf16.msra.mxu0 %v3445_v26 }
 0x355   :  { %3444 = vmatpush3.bf16.msra.mxu1 %v3441_v21  ;;  %3450 = vmatprep.subr.bf16.mxu0 %v3449_v29 }
 0x356   :  { %3246 = vmatmul.mubr.msk.f32.gmra.mrb[8].mxu0 %vm582_vm8, %v578_v23  ;;  %3454 = vmatprep.subr.bf16.mxu1 %v3453_v32 }
 0x357   :  { %3231 = vmatmul.mubr.msk.f32.gmra.mrb[6].mxu1 %vm582_vm8, %v578_v23 }
 0x358   :  { %3452 = vmatpush3.bf16.msra.mxu0 %v3449_v29 }
 0x359   :  { %3281 = vmatprep.subr.mxu0 %v4014_v8 }
 0x421   :  { %v738_v34 = vpop.f32.mrb[4].mxu0 }
 0x422   :  { %v658_v37 = vpop.f32.mrb[2].mxu1  ;;  %v739_v38 = vadd.f32 %v738_v34, %v579_v33  ;;  %v3241_v39 = vpop.f32.mrb[5].mxu0 }
 0x423   :  { %v659_v40 = vadd.f32 %v658_v37, %v579_v33  ;;  %v3226_v41 = vpop.f32.mrb[3].mxu1 }
 0x425   :  { %3256 = vmatprep.mubr.msk.f32.mxu1 %vm276_vm2, %v659_v40  ;;  %v743_v44 = vpop.f32.mrb[6].mxu0 }
 0x426   :  { %v663_v45 = vpop.f32.mrb[4].mxu1  ;;  %3257 = vmatmul.mubr.msk.f32.vlgmr.msra.gmra.mrb[8].mxu1 %vm276_vm2, %v739_v38  ;;  %v744_v46 = vadd.f32 %v743_v44, %v580_v42  ;;  %v3244_v47 = vpop.f32.mrb[7].mxu0 }
 0x427   :  { %v664_v48 = vadd.f32 %v663_v45, %v580_v42  ;;  %v3229_v49 = vpop.f32.mrb[5].mxu1  ;;  %3456 = vmatpush3.bf16.msra.mxu1 %v3453_v32 }
 0x428   :  { %3458 = vmatprep.subr.bf16.mxu1 %v3457_v43 }
 0x429   :  { %3267 = vmatprep.mubr.msk.f32.mxu0 %vm276_vm2, %v664_v48  ;;  %v748_v54 = vpop.f32.mrb[8].mxu0 }
 0x42a   :  { %3268 = vmatmul.mubr.msk.f32.vlgmr.msra.gmra.mrb[10].mxu0 %vm276_vm2, %v744_v46  ;;  %v668_v51 = vpop.f32.mrb[6].mxu1  ;;  %v749_v55 = vadd.f32 %v748_v54, %v581_v50  ;;  %v3247_v56 = vpop.f32.mrb[9].mxu0 }
 0x42b   :  { %v669_v52 = vadd.f32 %v668_v51, %v581_v50  ;;  %v3232_v53 = vpop.f32.mrb[7].mxu1  ;;  %3460 = vmatpush3.bf16.msra.mxu1 %v3457_v43  ;;  %3283 = vmatprep.mubr.msk.f32.mxu0 %vm4013_vm7, %v4014_v8 }
 0x42c   :  { %3286 = vmatprep.subr.mxu1 %v4014_v8 }
 0x42d   :  { %3278 = vmatprep.mubr.msk.f32.mxu1 %vm276_vm2, %v669_v52 }
 0x42e   :  { %3279 = vmatmul.mubr.msk.f32.vlgmr.msra.gmra.mrb[10].mxu1 %vm276_vm2, %v749_v55 }
 0x42f   :  { %3288 = vmatprep.mubr.msk.f32.mxu1 %vm4013_vm7, %v4014_v8 }
 0x4f9   :  { %v3258_v58 = vpop.f32.mrb[8].mxu1 }
 0x4fa   :  { %v841_v59 = vadd.f32 %v3258_v58, %v2989_v57  ;;  %v835_v60 = vpop.f32.mrb[9].mxu1 }
 0x4fb   :  { %v836_v61 = vadd.f32 %v2989_v57, %v835_v60 }
 0x4fc   :  { %1036 = vrot.lane.b32.xlu1 %v841_v59, %s4015_s11 }
 0x4fd   :  { %v3269_v63 = vpop.f32.mrb[10].mxu0  ;;  %1034 = vrot.lane.b32.xlu0 %v836_v61, %s4015_s11 }
 0x4fe   :  { %v935_v0 = vadd.f32 %v3269_v63, %v2992_v62  ;;  %v929_v1 = vpop.f32.mrb[11].mxu0 }
 0x4ff   :  { %v930_v2 = vadd.f32 %v2992_v62, %v929_v1 }
 0x500   :  { %3287 = vmatpush3.xpose.msk.msra.mxu1 %vm1080_vm9, %v935_v0  ;;  %1040 = vrot.lane.b32.xlu1 %v841_v59, %s4016_s21 }
 0x501   :  { %3282 = vmatpush3.xpose.msk.msra.mxu0 %vm1080_vm9, %v930_v2  ;;  %1038 = vrot.lane.b32.xlu0 %v836_v61, %s4016_s21  ;;  %v3280_v3 = vpop.f32.mrb[10].mxu1 }
 0x502   :  { %3296 = vmatprep.subr.mxu1 %v4014_v8  ;;  %3291 = vmatprep.subr.mxu0 %v4014_v8  ;;  %v1023_v4 = vpop.f32.mrb[11].mxu1  ;;  %v4439_v20 = vadd.f32 %v3280_v3, %v2995_v17 }
 0x503   :  { %3289 = vmatmul.mubr.msk.f32.vlgmr.msra.gmra.mrb[12].mxu1 %vm1080_vm9, %v841_v59  ;;  %v4443_v21 = vadd.f32 %v2995_v17, %v1023_v4 }
 0x504   :  { %1050 = vrot.lane.b32.xlu1 %v935_v0, %s4015_s11  ;;  %3284 = vmatmul.mubr.msk.f32.vlgmr.msra.gmra.mrb[12].mxu0 %vm1080_vm9, %v836_v61 }
 0x505   :  { %1048 = vrot.lane.b32.xlu0 %v930_v2, %s4015_s11  ;;  %3298 = vmatprep.mubr.msk.f32.mxu1 %vm4013_vm7, %v4014_v8 }
 0x506   :  { %3293 = vmatprep.mubr.msk.f32.mxu0 %vm4013_vm7, %v4014_v8 }
 0x508   :  { %1054 = vrot.lane.b32.xlu1 %v935_v0, %s4016_s21 }
 0x509   :  { %1052 = vrot.lane.b32.xlu0 %v930_v2, %s4016_s21 }
 0x50c   :  { %1058 = vrot.lane.b32.xlu1 %v935_v0, %s4017_s22 }
 0x50d   :  { %1056 = vrot.lane.b32.xlu0 %v930_v2, %s4017_s22 }
 0x510   :  { %1044 = vrot.lane.b32.xlu1 %v841_v59, %s4017_s22 }
 0x511   :  { %1042 = vrot.lane.b32.xlu0 %v836_v61, %s4017_s22 }
 0x56e   :  { %v1037_v9 = vpop.permute.xlu1 %1036 }
 0x56f   :  { %v1035_v10 = vpop.permute.xlu0 %1034 }
 0x572   :  { %v1041_v11 = vpop.permute.xlu1 %1040 }
 0x573   :  { %v1039_v12 = vpop.permute.xlu0 %1038 }
 0x576   :  { %v1051_v13 = vpop.permute.xlu1 %1050 }
 0x577   :  { %3297 = vmatpush3.xpose.msk.msra.mxu1 %vm1080_vm9, %v1051_v13  ;;  %v1049_v14 = vpop.permute.xlu0 %1048 }
 0x578   :  { %3292 = vmatpush3.xpose.msk.msra.mxu0 %vm1080_vm9, %v1049_v14  ;;  %3306 = vmatprep.subr.mxu1 %v4014_v8 }
 0x579   :  { %3301 = vmatprep.subr.mxu0 %v4014_v8 }
 0x57a   :  { %v1055_v15 = vpop.permute.xlu1 %1054  ;;  %3299 = vmatmul.mubr.msk.f32.vlgmr.msra.gmra.mrb[14].mxu1 %vm1080_vm9, %v1037_v9 }
 0x57b   :  { %3307 = vmatpush3.xpose.msk.msra.mxu1 %vm1080_vm9, %v1055_v15  ;;  %v1053_v16 = vpop.permute.xlu0 %1052  ;;  %3294 = vmatmul.mubr.msk.f32.vlgmr.msra.gmra.mrb[14].mxu0 %vm1080_vm9, %v1035_v10 }
 0x57c   :  { %3302 = vmatpush3.xpose.msk.msra.mxu0 %vm1080_vm9, %v1053_v16  ;;  %3308 = vmatprep.mubr.msk.f32.mxu1 %vm4013_vm7, %v4014_v8 }
 0x57d   :  { %3303 = vmatprep.mubr.msk.f32.mxu0 %vm4013_vm7, %v4014_v8  ;;  %3316 = vmatprep.subr.mxu1 %v4014_v8 }
 0x57e   :  { %v1059_v18 = vpop.permute.xlu1 %1058  ;;  %3309 = vmatmul.mubr.msk.f32.vlgmr.msra.gmra.mrb[16].mxu1 %vm1080_vm9, %v1041_v11  ;;  %3311 = vmatprep.subr.mxu0 %v4014_v8 }
 0x57f   :  { %3317 = vmatpush3.xpose.msk.msra.mxu1 %vm1080_vm9, %v1059_v18  ;;  %v1057_v19 = vpop.permute.xlu0 %1056  ;;  %3304 = vmatmul.mubr.msk.f32.vlgmr.msra.gmra.mrb[16].mxu0 %vm1080_vm9, %v1039_v12 }
 0x580   :  { %3312 = vmatpush3.xpose.msk.msra.mxu0 %vm1080_vm9, %v1057_v19  ;;  %3318 = vmatprep.mubr.msk.f32.mxu1 %vm4013_vm7, %v4014_v8 }
 0x581   :  { %3313 = vmatprep.mubr.msk.f32.mxu0 %vm4013_vm7, %v4014_v8  ;;  %3321 = vmatprep.subr.mxu0 %v4014_v8 }
 0x582   :  { %v1045_v22 = vpop.permute.xlu1 %1044  ;;  %3326 = vmatprep.subr.mxu1 %v4014_v8 }
 0x583   :  { %3319 = vmatmul.mubr.msk.f32.vlgmr.msra.gmra.mrb[18].mxu1 %vm1080_vm9, %v1045_v22  ;;  %v1043_v23 = vpop.permute.xlu0 %1042 }
 0x584   :  { %3314 = vmatmul.mubr.msk.f32.vlgmr.msra.gmra.mrb[18].mxu0 %vm1080_vm9, %v1043_v23  ;;  %3327 = vmatpush3.msra.mxu1 %v4439_v20 }
 0x585   :  { %3322 = vmatpush3.msra.mxu0 %v4443_v21  ;;  %3328 = vmatprep.mubr.msk.f32.mxu1 %vm4013_vm7, %v4014_v8 }
 0x586   :  { %3336 = vmatprep.subr.mxu1 %v4014_v8  ;;  %3323 = vmatprep.mubr.msk.f32.mxu0 %vm4013_vm7, %v4014_v8 }
 0x587   :  { %3331 = vmatprep.subr.mxu0 %v4014_v8 }
 0x5d6   :  { %v1225_v24 = vpop.f32.mrb[12].mxu1 }
 0x5d7   :  { %v1151_v25 = vpop.f32.mrb[12].mxu0  ;;  %v3290_v26 = vpop.f32.mrb[13].mxu1  ;;  %v1676_v27 = vsel %vm1080_vm9, %v1225_v24, -inf }
 0x5d8   :  { %1677 = vmax.xlane.f32.xlu1 %v1676_v27  ;;  %v3285_v28 = vpop.f32.mrb[13].mxu0  ;;  %v1673_v29 = vsel %vm1080_vm9, %v1151_v25, -inf }
 0x5d9   :  { %1674 = vmax.xlane.f32.xlu0 %v1673_v29 }
 0x64d   :  { %v1373_v30 = vpop.f32.mrb[14].mxu1 }
 0x64e   :  { %v1299_v31 = vpop.f32.mrb[14].mxu0  ;;  %v3300_v32 = vpop.f32.mrb[15].mxu1  ;;  %v1682_v39 = vsel %vm1080_vm9, %v1373_v30, -inf }
 0x64f   :  { %v3295_v33 = vpop.f32.mrb[15].mxu0  ;;  %v1679_v34 = vsel %vm1080_vm9, %v1299_v31, -inf }
 0x650   :  { %1680 = vmax.xlane.f32.xlu0 %v1679_v34 }
 0x651   :  { %v1521_v35 = vpop.f32.mrb[16].mxu1 }
 0x652   :  { %v1447_v36 = vpop.f32.mrb[16].mxu0  ;;  %v3310_v37 = vpop.f32.mrb[17].mxu1  ;;  %v1688_v44 = vsel %vm1080_vm9, %v1521_v35, -inf }
 0x653   :  { %v3305_v38 = vpop.f32.mrb[17].mxu0  ;;  %v1685_v40 = vsel %vm1080_vm9, %v1447_v36, -inf }
 0x654   :  { %1683 = vmax.xlane.f32.xlu0 %v1682_v39  ;;  %1686 = vmax.xlane.f32.xlu1 %v1685_v40 }
 0x656   :  { %v1669_v41 = vpop.f32.mrb[18].mxu1 }
 0x657   :  { %v1595_v42 = vpop.f32.mrb[18].mxu0  ;;  %v3320_v43 = vpop.f32.mrb[19].mxu1  ;;  %v1694_v47 = vsel %vm1080_vm9, %v1669_v41, -inf }
 0x658   :  { %1689 = vmax.xlane.f32.xlu0 %v1688_v44  ;;  %v3315_v45 = vpop.f32.mrb[19].mxu0  ;;  %v1691_v46 = vsel %vm1080_vm9, %v1595_v42, -inf }
 0x659   :  { %1692 = vmax.xlane.f32.xlu1 %v1691_v46 }
 0x65c   :  { %1695 = vmax.xlane.f32.xlu0 %v1694_v47 }
 0x665   :  { %v1678_v48 = vpop.xlane.xlu1 %1677 }
 0x666   :  { %v1698_v49 = vsub.f32 %v1225_v24, %v1678_v48  ;;  %v1675_v50 = vpop.xlane.xlu0 %1674 }
 0x667   :  { %v1697_v52 = vsub.f32 %v1151_v25, %v1675_v50 }
 0x668   :  { %v1707_v51 = vmul.f32 1.442695, %v1698_v49 }
 0x669   :  { %v1705_v53 = vmul.f32 1.442695, %v1697_v52 }
 0x66a   :  { %1062 = vrot.lane.b32.xlu1 %v4443_v21, %s4015_s11  ;;  %3634 = vpow2.f32 %v1707_v51 }
 0x66b   :  { %3636 = vpow2.f32 %v1705_v53 }
 0x66e   :  { %1068 = vrot.lane.b32.xlu1 %v4443_v21, %s4016_s21 }
 0x672   :  { %1064 = vrot.lane.b32.xlu0 %v4439_v20, %s4015_s11  ;;  %1070 = vrot.lane.b32.xlu1 %v4439_v20, %s4016_s21 }
 0x674   :  { %v3635_v54 = vpop.eup %3634 }
 0x675   :  { %v1724_v55 = vsel %vm1080_vm9, %v3635_v54, 0.0  ;;  %v3637_v56 = vpop.eup %3636 }
 0x676   :  { %v1721_v57 = vsel %vm1080_vm9, %v3637_v56, 0.0 }
 0x691   :  { %1725 = vadd.xlane.f32.xlu0 %v1724_v55 }
 0x696   :  { %1722 = vadd.xlane.f32.xlu1 %v1721_v57 }
 0x6dd   :  { %v1681_v58 = vpop.xlane.xlu0 %1680 }
 0x6de   :  { %v1699_v59 = vsub.f32 %v1299_v31, %v1681_v58 }
 0x6e0   :  { %v1709_v60 = vmul.f32 1.442695, %v1699_v59 }
 0x6e1   :  { %v1684_v61 = vpop.xlane.xlu0 %1683  ;;  %v1687_v62 = vpop.xlane.xlu1 %1686 }
 0x6e2   :  { %3638 = vpow2.f32 %v1709_v60  ;;  %v1700_v63 = vsub.f32 %v1373_v30, %v1684_v61  ;;  %v1701_v0 = vsub.f32 %v1447_v36, %v1687_v62  ;;  %v2376_v62 = vld [vmem:[#allocation17] sm:$0xff] }
 0x6e4   :  { %v1711_v1 = vmul.f32 1.442695, %v1700_v63  ;;  %v1713_v2 = vmul.f32 1.442695, %v1701_v0  ;;  %v2377_v63 = vld [vmem:[#allocation17 + $0x8] sm:$0xff] }
 0x6e5   :  { %v1690_v3 = vpop.xlane.xlu0 %1689  ;;  %v3461_v0 = vpack.c.bf16 %v2377_v63, %v2376_v62  ;;  %v2537_v62 = vld [vmem:[#allocation20 + $0x80] sm:$0xff]  ;;  %v2539_v63 = vld [vmem:[#allocation20 + $0x90] sm:$0xff] }
 0x6e6   :  { %3640 = vpow2.f32 %v1711_v1  ;;  %v1702_v4 = vsub.f32 %v1521_v35, %v1690_v3  ;;  %v1693_v9 = vpop.xlane.xlu1 %1692  ;;  %v2378_v1 = vld [vmem:[#allocation17 + $0x10] sm:$0xff] }
 0x6e7   :  { %3642 = vpow2.f32 %v1713_v2  ;;  %v1703_v10 = vsub.f32 %v1595_v42, %v1693_v9  ;;  %v2379_v2 = vld [vmem:[#allocation17 + $0x18] sm:$0xff] }
 0x6e8   :  { %v1715_v11 = vmul.f32 1.442695, %v1702_v4  ;;  %v3465_v3 = vpack.c.bf16 %v2379_v2, %v2378_v1  ;;  %v2544_v1 = vld [vmem:[#allocation20 + $0xb8] sm:$0xff]  ;;  %v3487_v2 = vpack.c.bf16 %v2539_v63, %v2537_v62  ;;  %v2577_v63 = vld [vmem:[#allocation20 + $0x1c0] sm:$0xff] }
 0x6e9   :  { %v1717_v12 = vmul.f32 1.442695, %v1703_v10  ;;  %v1696_v13 = vpop.xlane.xlu0 %1695 }
 0x6ea   :  { %3644 = vpow2.f32 %v1715_v11  ;;  %v1704_v14 = vsub.f32 %v1669_v41, %v1696_v13  ;;  %v1063_v30 = vpop.permute.xlu1 %1062 }
 0x6eb   :  { %3646 = vpow2.f32 %v1717_v12 }
 0x6ec   :  { %v3639_v15 = vpop.eup %3638  ;;  %v1719_v16 = vmul.f32 1.442695, %v1704_v14 }
 0x6ed   :  { %v1727_v17 = vsel %vm1080_vm9, %v3639_v15, 0.0  ;;  %v1065_v32 = vpop.permute.xlu0 %1064 }
 0x6ee   :  { %3648 = vpow2.f32 %v1719_v16  ;;  %1728 = vadd.xlane.f32.xlu1 %v1727_v17  ;;  %v1069_v31 = vpop.permute.xlu1 %1068 }
 0x6f0   :  { %v3641_v18 = vpop.eup %3640 }
 0x6f1   :  { %v3643_v19 = vpop.eup %3642  ;;  %v1730_v22 = vsel %vm1080_vm9, %v3641_v18, 0.0 }
 0x6f2   :  { %1731 = vadd.xlane.f32.xlu0 %v1730_v22  ;;  %v1733_v23 = vsel %vm1080_vm9, %v3643_v19, 0.0  ;;  %v1071_v34 = vpop.permute.xlu1 %1070 }
 0x6f3   :  { %1734 = vadd.xlane.f32.xlu1 %v1733_v23 }
 0x6f4   :  { %v3645_v24 = vpop.eup %3644 }
 0x6f5   :  { %v3647_v25 = vpop.eup %3646  ;;  %v1736_v26 = vsel %vm1080_vm9, %v3645_v24, 0.0 }
 0x6f6   :  { %1737 = vadd.xlane.f32.xlu0 %v1736_v26  ;;  %v1739_v27 = vsel %vm1080_vm9, %v3647_v25, 0.0 }
 0x6f7   :  { %1740 = vadd.xlane.f32.xlu1 %v1739_v27 }
 0x6f8   :  { %v4480_v28 = vpop.eup %3648 }
 0x6f9   :  { %v1742_v29 = vsel %vm1080_vm9, %v4480_v28, 0.0 }
 0x6fa   :  { %1743 = vadd.xlane.f32.xlu0 %v1742_v29 }
 0x708   :  { %1076 = vrot.lane.b32.xlu1 %v4439_v20, %s4017_s22 }
 0x710   :  { %1074 = vrot.lane.b32.xlu0 %v4443_v21, %s4017_s22 }
 0x71e   :  { %v1726_v33 = vpop.xlane.xlu0 %1725 }
 0x71f   :  { %3650 = vrcp.f32 %v1726_v33 }
 0x723   :  { %v1723_v35 = vpop.xlane.xlu1 %1722 }
 0x724   :  { %3652 = vrcp.f32 %v1723_v35  ;;  %v2522_v35 = vld [vmem:[#allocation20 + $0x8] sm:$0xff] }
 0x729   :  { %v3651_v36 = vpop.eup %3650 }
 0x72a   :  { %v1748_v37 = vmul.f32 %v3651_v36, %v3635_v54  ;;  %v2524_v36 = vld [vmem:[#allocation20 + $0x18] sm:$0xff] }
 0x72c   :  { %3329 = vmatmul.mubr.msk.f32.vlgmr.msra.gmra.mrb[20].mxu1 %vm1080_vm9, %v1748_v37 }
 0x72d   :  { %3337 = vmatpush3.msra.mxu1 %v1065_v32  ;;  %3338 = vmatprep.mubr.msk.f32.mxu1 %vm4013_vm7, %v4014_v8 }
 0x72e   :  { %v3653_v20 = vpop.eup %3652  ;;  %3346 = vmatprep.subr.mxu1 %v4014_v8 }
 0x72f   :  { %v1746_v21 = vmul.f32 %v3653_v20, %v3637_v56  ;;  %v3469_v20 = vpack.c.bf16 %v2524_v36, %v2522_v35  ;;  %v2559_v35 = vld [vmem:[#allocation20 + $0x130] sm:$0xff]  ;;  %v2562_v36 = vld [vmem:[#allocation20 + $0x148] sm:$0xff] }
 0x731   :  { %3324 = vmatmul.mubr.msk.f32.vlgmr.msra.gmra.mrb[20].mxu0 %vm1080_vm9, %v1746_v21  ;;  %v2521_v21 = vld [vmem:[#allocation20] sm:$0xff] }
 0x732   :  { %3332 = vmatpush3.msra.mxu0 %v1063_v30  ;;  %3333 = vmatprep.mubr.msk.f32.mxu0 %vm4013_vm7, %v4014_v8 }
 0x733   :  { %3341 = vmatprep.subr.mxu0 %v4014_v8 }
 0x77b   :  { %v1729_v38 = vpop.xlane.xlu1 %1728 }
 0x77c   :  { %3654 = vrcp.f32 %v1729_v38  ;;  %v2523_v38 = vld [vmem:[#allocation20 + $0x10] sm:$0xff] }
 0x77f   :  { %v1732_v39 = vpop.xlane.xlu0 %1731 }
 0x780   :  { %3656 = vrcp.f32 %v1732_v39  ;;  %v1735_v40 = vpop.xlane.xlu1 %1734  ;;  %v2585_v39 = vld [vmem:[#allocation3] sm:$0x3] }
 0x781   :  { %3658 = vrcp.f32 %v1735_v40  ;;  %v3471_v40 = vpack.c.bf16 %v2523_v38, %v2521_v21  ;;  %v2561_v38 = vld [vmem:[#allocation20 + $0x140] sm:$0xff] }
 0x783   :  { %v1738_v41 = vpop.xlane.xlu0 %1737 }
 0x784   :  { %3660 = vrcp.f32 %v1738_v41  ;;  %v1741_v42 = vpop.xlane.xlu1 %1740  ;;  %v2526_v41 = vld [vmem:[#allocation20 + $0x28] sm:$0xff] }
 0x785   :  { %3662 = vrcp.f32 %v1741_v42  ;;  %v2528_v42 = vld [vmem:[#allocation20 + $0x38] sm:$0xff] }
 0x786   :  { %v3655_v43 = vpop.eup %3654 }
 0x787   :  { %v1750_v44 = vmul.f32 %v3655_v43, %v3639_v15  ;;  %v1744_v45 = vpop.xlane.xlu0 %1743  ;;  %v3473_v43 = vpack.c.bf16 %v2528_v42, %v2526_v41  ;;  %v2568_v41 = vld [vmem:[#allocation20 + $0x178] sm:$0xff] }
 0x788   :  { %3664 = vrcp.f32 %v1744_v45  ;;  %v1077_v55 = vpop.permute.xlu1 %1076  ;;  %v2527_v45 = vld [vmem:[#allocation20 + $0x30] sm:$0xff] }
 0x789   :  { %3334 = vmatmul.mubr.msk.f32.vlgmr.msra.gmra.mrb[22].mxu0 %vm1080_vm9, %v1750_v44  ;;  %v2525_v44 = vld [vmem:[#allocation20 + $0x20] sm:$0xff] }
 0x78a   :  { %v3657_v46 = vpop.eup %3656  ;;  %3342 = vmatpush3.msra.mxu0 %v1069_v31  ;;  %3343 = vmatprep.mubr.msk.f32.mxu0 %vm4013_vm7, %v4014_v8 }
 0x78b   :  { %v3659_v47 = vpop.eup %3658  ;;  %v1752_v48 = vmul.f32 %v3657_v46, %v3641_v18  ;;  %3351 = vmatprep.subr.mxu0 %v4014_v8  ;;  %v1075_v50 = vpop.permute.xlu0 %1074  ;;  %v2530_v46 = vld [vmem:[#allocation20 + $0x48] sm:$0xff] }
 0x78c   :  { %v1754_v49 = vmul.f32 %v3659_v47, %v3643_v19  ;;  %v2532_v47 = vld [vmem:[#allocation20 + $0x58] sm:$0xff] }
 0x78d   :  { %3339 = vmatmul.mubr.msk.f32.vlgmr.msra.gmra.mrb[22].mxu1 %vm1080_vm9, %v1752_v48  ;;  %v3475_v48 = vpack.c.bf16 %v2527_v45, %v2525_v44  ;;  %v2565_v44 = vld [vmem:[#allocation20 + $0x160] sm:$0xff]  ;;  %v2567_v45 = vld [vmem:[#allocation20 + $0x170] sm:$0xff] }
 0x78e   :  { %v3661_v51 = vpop.eup %3660  ;;  %3344 = vmatmul.mubr.msk.f32.vlgmr.msra.gmra.mrb[24].mxu0 %vm1080_vm9, %v1754_v49  ;;  %3347 = vmatpush3.msra.mxu1 %v1071_v34  ;;  %v2586_v34 = vld [vmem:[#allocation22] sm:$0x77]  ;;  %v3477_v49 = vpack.c.bf16 %v2532_v47, %v2530_v46  ;;  %v2570_v46 = vld [vmem:[#allocation20 + $0x188] sm:$0xff]  ;;  %v2572_v47 = vld [vmem:[#allocation20 + $0x198] sm:$0xff] }
 0x78f   :  { %v3663_v52 = vpop.eup %3662  ;;  %v1756_v53 = vmul.f32 %v3661_v51, %v3645_v24  ;;  %3352 = vmatpush3.msra.mxu0 %v1075_v50  ;;  %3348 = vmatprep.mubr.msk.f32.mxu1 %vm4013_vm7, %v4014_v8  ;;  %v2588_v37 = vcombine.high %v2586_v34, %v2586_v34  ;;  %v2529_v50 = vld [vmem:[#allocation20 + $0x40] sm:$0xff]  ;;  %v2531_v51 = vld [vmem:[#allocation20 + $0x50] sm:$0xff] }
 0x790   :  { %v1758_v54 = vmul.f32 %v3663_v52, %v3647_v25  ;;  %3356 = vmatprep.subr.mxu1 %v4014_v8  ;;  %3353 = vmatprep.mubr.msk.f32.mxu0 %vm4013_vm7, %v4014_v8  ;;  %v2534_v52 = vld [vmem:[#allocation20 + $0x68] sm:$0xff] }
 0x791   :  { %3349 = vmatmul.mubr.msk.f32.vlgmr.msra.gmra.mrb[24].mxu1 %vm1080_vm9, %v1756_v53  ;;  %3462 = vmatprep.subr.bf16.mxu0 %v3461_v0  ;;  %v2536_v53 = vld [vmem:[#allocation20 + $0x78] sm:$0xff] }
 0x792   :  { %v3665_v56 = vpop.eup %3664  ;;  %3357 = vmatpush3.msra.mxu1 %v1077_v55  ;;  %3354 = vmatmul.mubr.msk.f32.vlgmr.msra.gmra.mrb[26].mxu0 %vm1080_vm9, %v1758_v54  ;;  %v3479_v54 = vpack.c.bf16 %v2531_v51, %v2529_v50  ;;  %v3481_v55 = vpack.c.bf16 %v2536_v53, %v2534_v52  ;;  %v2569_v50 = vld [vmem:[#allocation20 + $0x180] sm:$0xff]  ;;  %v2571_v51 = vld [vmem:[#allocation20 + $0x190] sm:$0xff]  ;;  %v2574_v52 = vld [vmem:[#allocation20 + $0x1a8] sm:$0xff] }
 0x793   :  { %v1760_v57 = vmul.f32 %v3665_v56, %v4480_v28  ;;  %3358 = vmatprep.mubr.msk.f32.mxu1 %vm4013_vm7, %v4014_v8  ;;  %3464 = vmatpush3.bf16.msra.mxu0 %v3461_v0  ;;  %v2533_v56 = vld [vmem:[#allocation20 + $0x60] sm:$0xff]  ;;  %v2542_v0 = vld [vmem:[#allocation20 + $0xa8] sm:$0xff]  ;;  %v2576_v53 = vld [vmem:[#allocation20 + $0x1b8] sm:$0xff] }
 0x794   :  { %3466 = vmatprep.subr.bf16.mxu0 %v3465_v3  ;;  %3025 = vmatprep.subr.msk.mxu1 %vm2593_vm11, %v2588_v37  ;;  %v2564_v37 = vld [vmem:[#allocation20 + $0x158] sm:$0xff] }
 0x795   :  { %3359 = vmatmul.mubr.msk.f32.vlgmr.msra.gmra.mrb[26].mxu1 %vm1080_vm9, %v1760_v57  ;;  %v2535_v57 = vld [vmem:[#allocation20 + $0x70] sm:$0xff]  ;;  %v3509_v21 = vpack.c.bf16 %v2564_v37, %v2562_v36 }
 0x796   :  { %2662 = vmatprep.mubr.f32.mxu1 %v4014_v8  ;;  %3026 = vmatpush1.msk.msra.mxu1 %vm2593_vm11, %v2586_v34  ;;  %v2557_v34 = vld [vmem:[#allocation20 + $0x120] sm:$0xff]  ;;  %v2761_v37 = vld [vmem:[%s4693_s15 + $0x8] sm:$0xff] }
 0x797   :  { %3468 = vmatpush3.bf16.msra.mxu0 %v3465_v3  ;;  %3470 = vmatprep.subr.bf16.mxu1 %v3469_v20  ;;  %v3489_v3 = vpack.c.bf16 %v2544_v1, %v2542_v0  ;;  %v3507_v20 = vpack.c.bf16 %v2559_v35, %v2557_v34  ;;  %v2579_v0 = vld [vmem:[#allocation20 + $0x1d0] sm:$0xff] }
 0x799   :  { %3027 = vmatmul.mubr.msk.f32.vlgmr.msra.gmra.mrb[28].mxu1 %vm2589_vm12, %v2585_v39  ;;  %v2563_v39 = vld [vmem:[#allocation20 + $0x150] sm:$0xff] }
 0x79a   :  { %3472 = vmatpush1.bf16.msra.mxu1 %v3471_v40  ;;  %v2566_v40 = vld [vmem:[#allocation20 + $0x168] sm:$0xff]  ;;  %v3511_v42 = vpack.c.bf16 %v2563_v39, %v2561_v38 }
 0x79b   :  { %3474 = vmatprep.subr.bf16.mxu1 %v3473_v43  ;;  %v3513_v43 = vpack.c.bf16 %v2568_v41, %v2566_v40 }
 0x79e   :  { %3476 = vmatpush1.bf16.msra.mxu1 %v3475_v48  ;;  %v3515_v48 = vpack.c.bf16 %v2567_v45, %v2565_v44 }
 0x79f   :  { %3478 = vmatprep.subr.bf16.mxu1 %v3477_v49  ;;  %v3517_v49 = vpack.c.bf16 %v2572_v47, %v2570_v46 }
 0x7a2   :  { %3480 = vmatpush1.bf16.msra.mxu1 %v3479_v54  ;;  %v3519_v54 = vpack.c.bf16 %v2571_v51, %v2569_v50  ;;  %v2763_v50 = vld [vmem:[%s4693_s15 + $0x18] sm:$0xff] }
 0x7a3   :  { %3482 = vmatprep.subr.bf16.mxu1 %v3481_v55  ;;  %v3521_v55 = vpack.c.bf16 %v2576_v53, %v2574_v52  ;;  %v2780_v52 = vld [vmem:[%s4693_s15 + $0xa0] sm:$0xff]  ;;  %v2781_v53 = vld [vmem:[%s4693_s15 + $0xa8] sm:$0xff] }
 0x7ff   :  { %v1903_v58 = vpop.f32.mrb[20].mxu1 }
 0x800   :  { %v3330_v59 = vpop.f32.mrb[21].mxu1 }
 0x801   :  { %v2540_v59 = vld [vmem:[#allocation20 + $0x98] sm:$0xff] }
 0x804   :  { %v1830_v60 = vpop.f32.mrb[20].mxu0 }
 0x805   :  { %v3325_v61 = vpop.f32.mrb[21].mxu0 }
 0x85c   :  { %v1976_v4 = vpop.f32.mrb[22].mxu0 }
 0x85d   :  { %2347 = vrot.lane.b32.xlu0 %v1976_v4, %s3992_s28  ;;  %v3335_v9 = vpop.f32.mrb[23].mxu0  ;;  %v2541_v4 = vld [vmem:[#allocation20 + $0xa0] sm:$0xff] }
 0x85e   :  { %v2543_v9 = vld [vmem:[#allocation20 + $0xb0] sm:$0xff] }
 0x860   :  { %v2049_v10 = vpop.f32.mrb[22].mxu1 }
 0x861   :  { %v2122_v11 = vpop.f32.mrb[24].mxu0  ;;  %v3340_v12 = vpop.f32.mrb[23].mxu1  ;;  %2349 = vrot.lane.b32.xlu1 %v2049_v10, %s3992_s28  ;;  %v2546_v10 = vld [vmem:[#allocation20 + $0xc8] sm:$0xff] }
 0x862   :  { %2355 = vrot.lane.b32.xlu0 %v2122_v11, %s4000_s2  ;;  %v3345_v13 = vpop.f32.mrb[25].mxu0  ;;  %v2548_v11 = vld [vmem:[#allocation20 + $0xd8] sm:$0xff]  ;;  %v3491_v12 = vpack.c.bf16 %v2543_v9, %v2541_v4 }
 0x863   :  { %v3493_v13 = vpack.c.bf16 %v2548_v11, %v2546_v10  ;;  %v2582_v10 = vld [vmem:[#allocation20 + $0x1e8] sm:$0xff]  ;;  %v2584_v11 = vld [vmem:[#allocation20 + $0x1f8] sm:$0xff] }
 0x864   :  { %v2195_v14 = vpop.f32.mrb[24].mxu1 }
 0x865   :  { %2357 = vrot.lane.b32.xlu1 %v2195_v14, %s4000_s2  ;;  %v3350_v15 = vpop.f32.mrb[25].mxu1  ;;  %v2268_v16 = vpop.f32.mrb[26].mxu0  ;;  %v2545_v14 = vld [vmem:[#allocation20 + $0xc0] sm:$0xff] }
 0x866   :  { %2363 = vrot.lane.b32.xlu0 %v2268_v16, %s4018_s18  ;;  %v3355_v17 = vpop.f32.mrb[27].mxu0  ;;  %v2547_v15 = vld [vmem:[#allocation20 + $0xd0] sm:$0xff]  ;;  %v2550_v16 = vld [vmem:[#allocation20 + $0xe8] sm:$0xff] }
 0x867   :  { %v2552_v17 = vld [vmem:[#allocation20 + $0xf8] sm:$0xff] }
 0x868   :  { %v2341_v18 = vpop.f32.mrb[26].mxu1 }
 0x869   :  { %2365 = vrot.lane.b32.xlu1 %v2341_v18, %s4018_s18  ;;  %v3360_v19 = vpop.f32.mrb[27].mxu1  ;;  %v3495_v18 = vpack.c.bf16 %v2547_v15, %v2545_v14  ;;  %v3529_v14 = vpack.c.bf16 %v2584_v11, %v2582_v10  ;;  %v2583_v15 = vld [vmem:[#allocation20 + $0x1f0] sm:$0xff]  ;;  %v2787_v11 = vld [vmem:[%s4693_s15 + $0xd8] sm:$0xff]  ;;  %s4711_s18 = sld [smem:[#allocation37_spill]] }
 0x86a   :  { %v3497_v19 = vpack.c.bf16 %v2552_v17, %v2550_v16  ;;  %v2786_v10 = vld [vmem:[%s4693_s15 + $0xd0] sm:$0xff] }
 0x8cf   :  { %v2348_v22 = vpop.permute.xlu0 %2347 }
 0x8d0   :  { %v2369_v25 = vsel %vm1080_vm9, %v1830_v60, %v2348_v22  ;;  %v3483_v60 = vpack.c.bf16 %v2535_v57, %v2533_v56  ;;  %v2549_v22 = vld [vmem:[#allocation20 + $0xe0] sm:$0xff]  ;;  %v2575_v57 = vld [vmem:[#allocation20 + $0x1b0] sm:$0xff] }
 0x8d1   :  { %v2573_v56 = vld [vmem:[#allocation20 + $0x1a0] sm:$0xff] }
 0x8d2   :  { %3484 = vmatpush1.bf16.msra.mxu1 %v3483_v60  ;;  %v2578_v60 = vld [vmem:[#allocation20 + $0x1c8] sm:$0xff] }
 0x8d3   :  { %v2350_v23 = vpop.permute.xlu1 %2349 }
 0x8d4   :  { %v2356_v24 = vpop.permute.xlu0 %2355  ;;  %v2370_v30 = vsel %vm1080_vm9, %v1903_v58, %v2350_v23  ;;  %v2538_v58 = vld [vmem:[#allocation20 + $0x88] sm:$0xff]  ;;  %v2551_v23 = vld [vmem:[#allocation20 + $0xf0] sm:$0xff] }
 0x8d5   :  { %v2372_v27 = vsel %vm2371_vm10, %v2369_v25, %v2356_v24  ;;  %v3485_v61 = vpack.c.bf16 %v2540_v59, %v2538_v58  ;;  %v2554_v24 = vld [vmem:[#allocation20 + $0x108] sm:$0xff]  ;;  %v2556_v25 = vld [vmem:[#allocation20 + $0x118] sm:$0xff]  ;;  %v3523_v58 = vpack.c.bf16 %v2575_v57, %v2573_v56 }
 0x8d6   :  { %v3022_v59 = vld [vmem:[#allocation19] ss:$0 sm:$0xff]  ;;  %v2764_v56 = vld [vmem:[%s4693_s15 + $0x20] sm:$0xff]  ;;  %v2765_v57 = vld [vmem:[%s4693_s15 + $0x28] sm:$0xff] }
 0x8d7   :  { %v2358_v26 = vpop.permute.xlu1 %2357  ;;  %3486 = vmatprep.subr.bf16.mxu1 %v3485_v61  ;;  %v2580_v61 = vld [vmem:[#allocation20 + $0x1d8] sm:$0xff] }
 0x8d8   :  { %v2364_v28 = vpop.permute.xlu0 %2363  ;;  %v2373_v31 = vsel %vm2371_vm10, %v2370_v30, %v2358_v26  ;;  %3488 = vmatpush1.bf16.msra.mxu1 %v3487_v2  ;;  %v3499_v26 = vpack.c.bf16 %v2551_v23, %v2549_v22  ;;  %v2558_v30 = vld [vmem:[#allocation20 + $0x128] sm:$0xff]  ;;  %v3525_v62 = vpack.c.bf16 %v2580_v61, %v2578_v60  ;;  %v3527_v2 = vpack.c.bf16 %v2579_v0, %v2577_v63  ;;  %v2767_v63 = vld [vmem:[%s4693_s15 + $0x38] sm:$0xff] }
 0x8d9   :  { %v2374_v29 = vsel %vm582_vm8, %v2372_v27, %v2364_v28  ;;  %3490 = vmatprep.subr.bf16.mxu1 %v3489_v3  ;;  %v3501_v27 = vpack.c.bf16 %v2556_v25, %v2554_v24  ;;  %v2553_v28 = vld [vmem:[#allocation20 + $0x100] sm:$0xff]  ;;  %v3543_v60 = vpack.c.bf16 %v2765_v57, %v2764_v56 }
 0x8da   :  { %3369 = vmatprep.mubr.msk.f32.mxu0 %vm276_vm2, %v2374_v29  ;;  %v2555_v29 = vld [vmem:[#allocation20 + $0x110] sm:$0xff]  ;;  %v2784_v0 = vld [vmem:[%s4693_s15 + $0xc0] sm:$0xff] }
 0x8db   :  { %v2366_v32 = vpop.permute.xlu1 %2365 }
 0x8dc   :  { %v2375_v33 = vsel %vm582_vm8, %v2373_v31, %v2366_v32  ;;  %3492 = vmatpush1.bf16.msra.mxu1 %v3491_v12  ;;  %v2560_v31 = vld [vmem:[#allocation20 + $0x138] sm:$0xff]  ;;  %v3503_v32 = vpack.c.bf16 %v2555_v29, %v2553_v28  ;;  %v2581_v12 = vld [vmem:[#allocation20 + $0x1e0] sm:$0xff] }
 0x8dd   :  { %3370 = vmatmul.mubr.msk.f32.vlgmr.msra.gmra.mrb[28].mxu0 %vm276_vm2, %v2375_v33  ;;  %3494 = vmatprep.subr.bf16.mxu1 %v3493_v13  ;;  %v3505_v33 = vpack.c.bf16 %v2560_v31, %v2558_v30  ;;  %v3531_v17 = vpack.c.bf16 %v2583_v15, %v2581_v12  ;;  %v2777_v31 = vld [vmem:[%s4693_s15 + $0x88] sm:$0xff]  ;;  %v2771_v15 = vld [vmem:[%s4693_s15 + $0x58] sm:$0xff] }
 0x8e0   :  { %3496 = vmatpush1.bf16.msra.mxu1 %v3495_v18 }
 0x8e1   :  { %3498 = vmatprep.subr.bf16.mxu1 %v3497_v19 }
 0x8e4   :  { %3500 = vmatpush1.bf16.msra.mxu1 %v3499_v26 }
 0x8e5   :  { %3502 = vmatprep.subr.bf16.mxu1 %v3501_v27 }
 0x8e8   :  { %3504 = vmatpush1.bf16.msra.mxu1 %v3503_v32  ;;  %v2760_v32 = vld [vmem:[%s4693_s15] sm:$0xff] }
 0x8e9   :  { %3506 = vmatprep.subr.bf16.mxu1 %v3505_v33  ;;  %v3535_v47 = vpack.c.bf16 %v2761_v37, %v2760_v32  ;;  %v2788_v32 = vld [vmem:[%s4693_s15 + $0xe0] sm:$0xff] }
 0x8ec   :  { %3508 = vmatpush1.bf16.msra.mxu1 %v3507_v20  ;;  %v2778_v20 = vld [vmem:[%s4693_s15 + $0x90] sm:$0xff] }
 0x8ed   :  { %3510 = vmatprep.subr.bf16.mxu1 %v3509_v21  ;;  %v2779_v21 = vld [vmem:[%s4693_s15 + $0x98] sm:$0xff] }
 0x8f0   :  { %3512 = vmatpush1.bf16.msra.mxu1 %v3511_v42 }
 0x8f1   :  { %3514 = vmatprep.subr.bf16.mxu1 %v3513_v43 }
 0x8f4   :  { %3516 = vmatpush1.bf16.msra.mxu1 %v3515_v48  ;;  %v3537_v48 = vpack.c.bf16 %v2779_v21, %v2778_v20  ;;  %v2790_v20 = vld [vmem:[%s4693_s15 + $0xf0] sm:$0xff]  ;;  %v2791_v21 = vld [vmem:[%s4693_s15 + $0xf8] sm:$0xff] }
 0x8f5   :  { %3518 = vmatprep.subr.bf16.mxu1 %v3517_v49  ;;  %v2762_v49 = vld [vmem:[%s4693_s15 + $0x10] sm:$0xff] }
 0x8f8   :  { %3520 = vmatpush1.bf16.msra.mxu1 %v3519_v54  ;;  %v3539_v54 = vpack.c.bf16 %v2763_v50, %v2762_v49 }
 0x8f9   :  { %3522 = vmatprep.subr.bf16.mxu1 %v3521_v55  ;;  %v3541_v55 = vpack.c.bf16 %v2781_v53, %v2780_v52  ;;  %v2872_v53 = vld [vmem:[%s4695_s17] sm:$0xff] }
 0x8fc   :  { %3524 = vmatpush1.bf16.msra.mxu1 %v3523_v58  ;;  %v2782_v58 = vld [vmem:[%s4693_s15 + $0xb0] sm:$0xff] }
 0x8fd   :  { %3526 = vmatprep.subr.bf16.mxu1 %v3525_v62  ;;  %v2766_v62 = vld [vmem:[%s4693_s15 + $0x30] sm:$0xff] }
 0x900   :  { %3528 = vmatpush1.bf16.msra.mxu1 %v3527_v2  ;;  %v3547_v2 = vpack.c.bf16 %v2767_v63, %v2766_v62  ;;  %v2876_v63 = vld [vmem:[%s4695_s17 + $0x20] sm:$0xff] }
 0x901   :  { %3530 = vmatprep.subr.bf16.mxu1 %v3529_v14  ;;  %v2770_v14 = vld [vmem:[%s4693_s15 + $0x50] sm:$0xff] }
 0x904   :  { %3532 = vmatpush1.bf16.msra.mxu1 %v3531_v17 }
 0x9b0   :  { %v3371_v1 = vpop.f32.mrb[28].mxu0 }
 0x9b1   :  { %v2465_v3 = vadd.f32 %v3371_v1, %v3022_v59  ;;  %v2459_v4 = vpop.f32.mrb[29].mxu0  ;;  %v2785_v1 = vld [vmem:[%s4693_s15 + $0xc8] sm:$0xff] }
 0x9b2   :  { %v2460_v9 = vadd.f32 %v3022_v59, %v2459_v4  ;;  %v2783_v59 = vld [vmem:[%s4693_s15 + $0xb8] sm:$0xff]  ;;  %v2768_v4 = vld [vmem:[%s4693_s15 + $0x40] sm:$0xff] }
 0x9b3   :  { %v2469_v13 = vadd.f32 %v2465_v3, %v4355_v6  ;;  %v2776_v6 = vld [vmem:[%s4693_s15 + $0x80] sm:$0xff]  ;;  %v3545_v61 = vpack.c.bf16 %v2783_v59, %v2782_v58  ;;  %v3549_v3 = vpack.c.bf16 %v2785_v1, %v2784_v0  ;;  %v2874_v59 = vld [vmem:[%s4695_s17 + $0x10] sm:$0xff]  ;;  %v2877_v0 = vld [vmem:[%s4695_s17 + $0x28] sm:$0xff] }
 0x9b4   :  { %v2468_v16 = vadd.f32 %v2460_v9, %v4349_v5  ;;  %v3533_v46 = vpack.c.bf16 %v2777_v31, %v2776_v6  ;;  %v2769_v9 = vld [vmem:[%s4693_s15 + $0x48] sm:$0xff]  ;;  %v3572_v1 = vpack.c.bf16 %v2877_v0, %v2876_v63 }
 0x9b5   :  { %v2482_v18 = vrot.slane %v2469_v13, 1  ;;  %v2504_v19 = vrot.slane %v2469_v13, 5  ;;  %v2498_v22 = vrot.slane %v2469_v13, 4  ;;  %v2488_v23 = vrot.slane %v2469_v13, 2 }
 0x9b6   :  { %v2481_v24 = vrot.slane %v2468_v16, 2  ;;  %v2503_v25 = vrot.slane %v2468_v16, 6  ;;  %v2476_v26 = vrot.slane %v2468_v16, 1  ;;  %v2497_v27 = vrot.slane %v2468_v16, 5  ;;  %3534 = vmatprep.subr.bf16.mxu0 %v3533_v46 }
 0x9b7   :  { %v2487_v28 = vrot.slane %v2468_v16, 3  ;;  %v2509_v29 = vrot.slane %v2468_v16, 7  ;;  %v2510_v30 = vrot.slane %v2469_v13, 6  ;;  %v2472_v5 = vrot.slane %v2469_v13, 7  ;;  %3536 = vmatpush3.bf16.msra.mxu0 %v3535_v47 }
 0x9b8   :  { %v2483_v33 = vsel %vm2473_vm13, %v2482_v18, %v2481_v24  ;;  %v2505_v34 = vsel %vm2473_vm13, %v2504_v19, %v2503_v25  ;;  %v2477_v35 = vsel %vm2473_vm13, %v2469_v13, %v2476_v26  ;;  %v2499_v36 = vsel %vm2473_vm13, %v2498_v22, %v2497_v27  ;;  %3538 = vmatprep.subr.bf16.mxu0 %v3537_v48 }
 0x9b9   :  { %v3623_v38 = vpack.i.bf16 %v2483_v33, %v2505_v34  ;;  %v3618_v39 = vpack.i.bf16 %v2477_v35, %v2499_v36  ;;  %v2489_v40 = vsel %vm2473_vm13, %v2488_v23, %v2487_v28  ;;  %v2511_v41 = vsel %vm2473_vm13, %v2510_v30, %v2509_v29  ;;  %v2789_v33 = vld [vmem:[%s4693_s15 + $0xe8] sm:$0xff]  ;;  %v2772_v35 = vld [vmem:[%s4693_s15 + $0x60] sm:$0xff] }
 0x9ba   :  { %v3628_v42 = vpack.i.bf16 %v2489_v40, %v2511_v41  ;;  %v2474_v43 = vsel %vm2473_vm13, %v2472_v5, %v2468_v16  ;;  %v2493_v44 = vrot.slane %v2468_v16, 4  ;;  %v2494_v45 = vrot.slane %v2469_v13, 3  ;;  %v2773_v36 = vld [vmem:[%s4693_s15 + $0x68] sm:$0xff]  ;;  %v2775_v40 = vld [vmem:[%s4693_s15 + $0x78] sm:$0xff] }
 0x9bb   :  { %3624 = vrot.lane.b32.xlu1 %v3623_v38, %s4010_s27  ;;  %3619 = vrot.lane.b32.xlu0 %v3618_v39, %s4009_s7  ;;  %v3551_v12 = vpack.c.bf16 %v2769_v9, %v2768_v4  ;;  %v3553_v13 = vpack.c.bf16 %v2787_v11, %v2786_v10  ;;  %v3555_v16 = vpack.c.bf16 %v2771_v15, %v2770_v14  ;;  %v2774_v38 = vld [vmem:[%s4693_s15 + $0x70] sm:$0xff]  ;;  %v3028_v9 = vld [vmem:[%s4694_s16] ss:$0 sm:$0xff] }
 0x9bc   :  { %v2495_v51 = vsel %vm2473_vm13, %v2494_v45, %v2493_v44  ;;  %3540 = vmatpush3.bf16.msra.mxu0 %v3539_v54  ;;  %v3557_v34 = vpack.c.bf16 %v2789_v33, %v2788_v32  ;;  %v3559_v37 = vpack.c.bf16 %v2773_v36, %v2772_v35  ;;  %v3561_v39 = vpack.c.bf16 %v2791_v21, %v2790_v20  ;;  %v2740_v45 = vld [vmem:[#allocation23] sm:$0x3]  ;;  %v2873_v54 = vld [vmem:[%s4695_s17 + $0x8] sm:$0xff]  ;;  %v3029_v15 = vld [vmem:[#allocation2] ss:$0 sm:$0xff] }
 0x9bd   :  { %3542 = vmatprep.subr.bf16.mxu0 %v3541_v55  ;;  %v3563_v41 = vpack.c.bf16 %v2775_v40, %v2774_v38  ;;  %v3566_v57 = vpack.c.bf16 %v2873_v54, %v2872_v53 }
 0x9bf   :  { %3629 = vrot.lane.b32.xlu0 %v3628_v42, %s4011_s19  ;;  %v2742_v42 = vlaneseq }
 0x9c0   :  { %3544 = vmatpush3.bf16.msra.mxu0 %v3543_v60  ;;  %v2875_v60 = vld [vmem:[%s4695_s17 + $0x18] sm:$0xff] }
 0x9c1   :  { %3546 = vmatprep.subr.bf16.mxu0 %v3545_v61  ;;  %v3569_v62 = vpack.c.bf16 %v2875_v60, %v2874_v59 }
 0x9c4   :  { %3548 = vmatpush3.bf16.msra.mxu0 %v3547_v2  ;;  %v2878_v2 = vld [vmem:[%s4695_s17 + $0x30] sm:$0xff] }
 0x9c5   :  { %3550 = vmatprep.subr.bf16.mxu0 %v3549_v3 }
 0x9c8   :  { %3552 = vmatpush3.bf16.msra.mxu0 %v3551_v12 }
 0x9c9   :  { %3554 = vmatprep.subr.bf16.mxu0 %v3553_v13 }
 0x9cc   :  { %3556 = vmatpush3.bf16.msra.mxu0 %v3555_v16 }
 0x9cd   :  { %3558 = vmatprep.subr.bf16.mxu0 %v3557_v34 }
 0x9d0   :  { %3560 = vmatpush3.bf16.msra.mxu0 %v3559_v37 }
 0x9d1   :  { %3562 = vmatprep.subr.bf16.mxu0 %v3561_v39 }
 0x9d4   :  { %3564 = vmatpush3.bf16.msra.mxu0 %v3563_v41 }
 0x9d5   :  { %3565 = vmatprep.subr.bf16.mxu0 %v4012_v7 }
 0xa2d   :  { %v3625_v17 = vpop.permute.xlu1 %3624  ;;  %v3620_v18 = vpop.permute.xlu0 %3619 }
 0xa2e   :  { %v3622_v19 = vunpack.i.h.bf16 %v3620_v18  ;;  %v3621_v22 = vunpack.i.l.bf16 %v3620_v18  ;;  %v3627_v23 = vunpack.i.h.bf16 %v3625_v17  ;;  %v3626_v24 = vunpack.i.l.bf16 %v3625_v17 }
 0xa30   :  { %v2515_v25 = vsel %vm276_vm2, %v2474_v43, %v3622_v19  ;;  %v2518_v26 = vsel %vm276_vm2, %v2495_v51, %v3621_v22  ;;  %v2743_v43 = vshrl.u32 %v2742_v42, 7 }
 0xa31   :  { %v3630_v27 = vpop.permute.xlu0 %3629  ;;  %v2519_v29 = vsel %vm279_vm3, %v2518_v26, %v3626_v24  ;;  %v2516_v30 = vsel %vm279_vm3, %v2515_v25, %v3627_v23 }
 0xa32   :  { %v3632_v6 = vunpack.i.h.bf16 %v3630_v27  ;;  %v3631_v28 = vunpack.i.l.bf16 %v3630_v27  ;;  %v2744_v44 = vsub.s32 0, %v2743_v43  ;;  %v2748_v46 = vsub.s32 1, %v2743_v43 }
 0xa34   :  { %v2520_v5 = vsel %vm294_vm4, %v2519_v29, %v3631_v28  ;;  %v2517_v31 = vsel %vm294_vm4, %v2516_v30, %v3632_v6  ;;  %v2745_v47 = vrot.slane %v2740_v45, %v2744_v44  ;;  %v2749_v48 = vrot.slane %v2740_v45, %v2748_v46 }
 0xa35   :  { %2733 = vmatprep.mubr.f32.mxu1 %v2520_v5 }
 0xa36   :  { %2734 = vmatmul.mubr.f32.vlgmr.msra.gmra.mrb[28].mxu1 %v2517_v31 }
 0xb09   :  { %v2735_v49 = vpop.f32.mrb[28].mxu1 }
 0xb0a   :  { %v2752_v50 = vadd.f32 %v2745_v47, %v2735_v49  ;;  %v2737_v51 = vpop.f32.mrb[29].mxu1 }
 0xb0b   :  { %v2753_v52 = vadd.f32 %v2749_v48, %v2737_v51 }
 0xb0c   :  { %v2756_v55 = vmul.f32 0.01, %v2752_v50  ;;  %vm2754_vm14 = vcmp.ge.f32.partialorder %v2752_v50, 0.0 }
 0xb0d   :  { %v2757_v56 = vmul.f32 0.01, %v2753_v52  ;;  %vm2755_vm15 = vcmp.ge.f32.partialorder %v2753_v52, 0.0 }
 0xb0e   :  { %v2758_v61 = vsel %vm2754_vm14, %v2752_v50, %v2756_v55 }
 0xb0f   :  { %v2759_v58 = vsel %vm2755_vm15, %v2753_v52, %v2757_v56 }
 0xb10   :  { %2863 = vmatprep.mubr.f32.mxu0 %v2759_v58 }
 0xb11   :  { %2864 = vmatmul.mubr.f32.vlgmr.msra.gmra.mrb[30].mxu0 %v2758_v61 }
 0xb12   :  { %3567 = vmatpush3.bf16.msra.mxu0 %v3566_v57  ;;  %3388 = vmatprep.mubr.msk.f32.mxu0 %vm4013_vm7, %v4014_v8  ;;  %v2879_v8 = vld [vmem:[%s4695_s17 + $0x38] sm:$0xff] }
 0xb13   :  { %3568 = vmatprep.subr.bf16.mxu0 %v4012_v7  ;;  %v3575_v3 = vpack.c.bf16 %v2879_v8, %v2878_v2 }
 0xb16   :  { %3570 = vmatpush3.bf16.msra.mxu0 %v3569_v62 }
 0xb17   :  { %3571 = vmatprep.subr.bf16.mxu0 %v4012_v7 }
 0xb1a   :  { %3573 = vmatpush3.bf16.msra.mxu0 %v3572_v1 }
 0xb1b   :  { %3574 = vmatprep.subr.bf16.mxu0 %v4012_v7 }
 0xb1e   :  { %3576 = vmatpush3.bf16.msra.mxu0 %v3575_v3 }
 0xbe4   :  { %v3157_v4 = vpop.f32.mrb[30].mxu0 }
 0xbe5   :  { %v3158_v10 = vpop.f32.mrb[31].mxu0 }
 0xbe6   :  { %v3159_v11 = vadd.f32 %v3158_v10, %v3157_v4 }
 0xbe8   :  { %v2866_v12 = vadd.f32 %v3159_v11, %v3028_v9 }
 0xbea   :  { %vm2869_vm0 = vcmp.ge.f32.partialorder %v2866_v12, 0.0  ;;  %v2870_v13 = vmul.f32 0.01, %v2866_v12 }
 0xbec   :  { %v2871_v14 = vsel %vm2869_vm0, %v2866_v12, %v2870_v13 }
 0xbed   :  { %3389 = vmatmul.mubr.msk.f32.vlgmr.msra.gmra.mrb[32].mxu0 %vm279_vm3, %v2871_v14 }
 0xcc0   :  { %v2956_v16 = vpop.f32.mrb[32].mxu0 }
 0xcc1   :  { %v2957_v17 = vadd.f32 %v3029_v15, %v2956_v16  ;;  %v3390_v18 = vpop.f32.mrb[33].mxu0 }
 0xcc3   :  { %v2960_v7 = vmax.f32 %v2957_v17, 0.0 }
 0xcc5   :  { %2962 = vst.msk [vmem:[%s4711_s18] sm:$0x3] %vm2961_vm1, %v2960_v7 }
 0xcc6   :  { %2967 = vsyncpa [#allocation4], 1 }
 0xcc7   :  { %2968 = vsyncpa [#allocation6], 1 }
 0xcc8   :  { %2969 = vsyncpa [#allocation9], 1 }
 0xcc9   :  { %2970 = vsyncpa [#allocation12], 1 }
 0xcca   :  { %2971 = vsyncpa [#allocation15], 1 }
 0xccb   :  { %2972 = vsyncpa [#allocation18], 1 }
 0xccc   :  { %2973 = vsyncpa [#allocation21], 1 }
 0xccd   :  { %2974 = vsyncpa [#allocation24], 1 }

</bundles_post_ra>
